<compile_context>
chip_gen: v5e
topology: v5e:2x2
jax: 0.10.0
libtpu: 0.0.40
codegen_flags: <defaults>
</compile_context>

<pallas_src>
import functools

import numpy as np
import jax
import jax.numpy as jnp
from jax.experimental import pallas as pl
from jax.experimental.pallas import tpu as pltpu


def build_interp_matrix(in_size: int, out_size: int) -> np.ndarray:
    """Bilinear interpolation matrix, PyTorch align_corners=False semantics."""
    o = np.arange(out_size)
    src = (o + 0.5) * (in_size / out_size) - 0.5
    src = np.clip(src, 0.0, None)          # PyTorch clamps negative src to 0
    i0 = np.minimum(np.floor(src).astype(np.int64), in_size - 1)
    i1 = np.minimum(i0 + 1, in_size - 1)
    lam = (src - i0).astype(np.float32)
    W = np.zeros((out_size, in_size), dtype=np.float32)
    W[o, i0] += (1.0 - lam)
    W[o, i1] += lam
    return W


@functools.lru_cache(maxsize=None)
def _decoder_weights(H: int, W: int, scale: int):
    """Build (once per shape) the two small interpolation matrices (numpy, f32)."""
    H_out, W_out = H * scale, W * scale
    wh = build_interp_matrix(H, H_out)                                # (H_out, H)
    wwt = np.ascontiguousarray(build_interp_matrix(W, W_out).T)       # (W, W_out)
    return wh, wwt


def _num_tensorcores() -> int:
    """Best-effort count of TensorCores behind one Pallas device (megacore chips)."""
    try:
        kind = jax.devices()[0].device_kind.lower()
    except Exception:
        return 1
    # v4 / v5p megacore and v7x expose two TensorCores per device.
    return 2 if any(tag in kind for tag in ("v4", "v5p", "v7")) else 1


def _pick_grid_steps(bc_total: int) -> int:
    """1 step on single-TC chips; 2 parallel steps on multi-TC chips (if divisible)."""
    if _num_tensorcores() >= 2 and bc_total % 2 == 0:
        return 2
    return 1


def decoder_kernel(wh_ref, wwt_ref, x_ref, o_ref):
    # wh_ref: (H_out, H)     wwt_ref: (W, W_out)
    # x_ref:  (bc_blk*H, W)  o_ref:   (bc_blk*H_out, W_out)
    h_out, h_in = wh_ref.shape
    w_out = wwt_ref.shape[1]
    bc_blk = x_ref.shape[0] // h_in

    # Stage 1: width upsample -- one MXU matmul over all channel rows of the block.
    tmp = jnp.dot(x_ref[...], wwt_ref[...],
                  preferred_element_type=jnp.float32)          # (bc_blk*H, W_out)

    # Stage 2: height upsample as a channel-batched matmul (no kron, no transpose).
    # Reshapes are tile-aligned (H multiple of 8, W_out multiple of 128) -> free.
    tmp3 = tmp.reshape(bc_blk, h_in, w_out)                    # (bc_blk, H, W_out)
    wh_b = jnp.broadcast_to(wh_ref[...], (bc_blk, h_out, h_in))
    out = jax.lax.dot_general(
        wh_b, tmp3,
        dimension_numbers=(((2,), (1,)), ((0,), (0,))),
        preferred_element_type=jnp.float32)                    # (bc_blk, H_out, W_out)

    o_ref[...] = out.reshape(bc_blk * h_out, w_out).astype(o_ref.dtype)


@functools.partial(jax.jit, static_argnames=("scale",))
def decoder_forward(x: jax.Array, scale: int = 16) -> jax.Array:
    """x: (B, C, H, W) -> (B, C, H*scale, W*scale), bilinear, align_corners=False."""
    B, C, H, W = x.shape
    H_out, W_out = H * scale, W * scale
    wh_np, wwt_np = _decoder_weights(H, W, scale)
    wh = jnp.asarray(wh_np)          # (H_out, H)   -- 16 KiB, not kron-inflated
    wwt = jnp.asarray(wwt_np)        # (W, W_out)

    BC = B * C
    G = _pick_grid_steps(BC)
    bc_blk = BC // G

    # Contiguity-preserving (free) reshape: fold batch+channels into the row dim
    # so stage 1 is one matmul and the output lands directly in NCHW row order.
    x2 = x.reshape(BC * H, W)

    itemsize = jnp.dtype(x.dtype).itemsize
    flops = 2 * BC * (H * W * W_out + H_out * H * W_out)
    bytes_accessed = (itemsize * BC * H * W            # input
                      + 4 * (H_out * H + W * W_out)    # weights
                      + itemsize * BC * H_out * W_out) # output (dominant)

    out2 = pl.pallas_call(
        decoder_kernel,
        out_shape=jax.ShapeDtypeStruct((BC * H_out, W_out), x.dtype),
        grid_spec=pltpu.PrefetchScalarGridSpec(
            num_scalar_prefetch=0,
            grid=(G,),
            in_specs=[
                pl.BlockSpec((H_out, H), lambda g: (0, 0)),       # constant tile
                pl.BlockSpec((W, W_out), lambda g: (0, 0)),       # constant tile
                pl.BlockSpec((bc_blk * H, W), lambda g: (g, 0)),
            ],
            out_specs=pl.BlockSpec((bc_blk * H_out, W_out), lambda g: (g, 0)),
        ),
        compiler_params=pltpu.CompilerParams(
            dimension_semantics=("parallel",)),
        cost_estimate=pl.CostEstimate(
            flops=flops, transcendentals=0, bytes_accessed=bytes_accessed),
    )(wh, wwt, x2)

    return out2.reshape(B, C, H_out, W_out)


if __name__ == "__main__":
    # Shapes consistent with Decoder(in_channels=4, out_channels=4, scale=16)
    B, C, H, W, scale = 2, 4, 16, 16, 16
    key = jax.random.PRNGKey(0)
    x = jax.random.normal(key, (B, C, H, W), dtype=jnp.float32)

    out = decoder_forward(x, scale=scale)
    out = jax.block_until_ready(out)
    assert out.shape == (B, C, H * scale, W * scale), out.shape

    # Pure-JAX reference using the same half-pixel-center interpolation matrices
    # (matches torch.nn.functional.interpolate bilinear, align_corners=False).
    # TODO(synk): cross-check against torch.nn.functional.interpolate offline
    # (no torch available in-sandbox); matrix construction follows its non-cubic path.
    wh = jnp.asarray(build_interp_matrix(H, H * scale))
    ww = jnp.asarray(build_interp_matrix(W, W * scale))
    ref = jnp.einsum('oh,bchw,pw->bcop', wh, x, ww)
    np.testing.assert_allclose(np.asarray(out), np.asarray(ref), atol=1e-4, rtol=1e-4)

    print("KERNEL_OK")
</pallas_src>

<mosaic_0001>
module attributes {stable_mosaic.version = 11 : i64} {
  func.func @decoder_kernel(%arg0: i32, %arg1: memref<256x16xf32, #tpu.memory_space<vmem>>, %arg2: memref<16x256xf32, #tpu.memory_space<vmem>>, %arg3: memref<128x16xf32, #tpu.memory_space<vmem>>, %arg4: memref<2048x256xf32, #tpu.memory_space<vmem>>) attributes {dimension_semantics = [#tpu.dimension_semantics<parallel>], iteration_bounds = array<i64: 1>, scalar_prefetch = 0 : i64, scratch_operands = 0 : i64, tpu.core_type = #tpu.core_type<tc>, window_params = [{pipeline_mode = #tpu.pipeline_mode<synchronous>, transform_indices = @transform_0, window_bounds = array<i64: 256, 16>}, {pipeline_mode = #tpu.pipeline_mode<synchronous>, transform_indices = @transform_1, window_bounds = array<i64: 16, 256>}, {transform_indices = @transform_2, window_bounds = array<i64: 128, 16>}, {transform_indices = @transform_3, window_bounds = array<i64: 2048, 256>}]} {
    %c0 = arith.constant 0 : index
    %c0_0 = arith.constant 0 : index
    %0 = vector.load %arg3[%c0, %c0_0] : memref<128x16xf32, #tpu.memory_space<vmem>>, vector<128x16xf32>
    %c0_1 = arith.constant 0 : index
    %c0_2 = arith.constant 0 : index
    %1 = vector.load %arg2[%c0_1, %c0_2] : memref<16x256xf32, #tpu.memory_space<vmem>>, vector<16x256xf32>
    %cst = arith.constant dense<0.000000e+00> : vector<128x256xf32>
    %2 = tpu.matmul %0, %1, %cst {dimension_numbers = #tpu.dot_dimension_numbers<[1], [0], [0], [1], [0, 0, 1, 1], [], []>} : vector<128x16xf32>, vector<16x256xf32>, vector<128x256xf32> -> vector<128x256xf32>
    %3 = vector.shape_cast %2 : vector<128x256xf32> to vector<8x16x256xf32>
    %c0_3 = arith.constant 0 : index
    %c0_4 = arith.constant 0 : index
    %4 = vector.load %arg1[%c0_3, %c0_4] : memref<256x16xf32, #tpu.memory_space<vmem>>, vector<256x16xf32>
    %5 = vector.shape_cast %4 : vector<256x16xf32> to vector<1x256x16xf32>
    %6 = vector.broadcast %5 : vector<1x256x16xf32> to vector<8x256x16xf32>
    %cst_5 = arith.constant dense<0.000000e+00> : vector<8x256x256xf32>
    %7 = tpu.matmul %6, %3, %cst_5 {dimension_numbers = #tpu.dot_dimension_numbers<[2], [1], [1], [2], [0, 0, 0, 1, 1, 2], [0], [0]>} : vector<8x256x16xf32>, vector<8x16x256xf32>, vector<8x256x256xf32> -> vector<8x256x256xf32>
    %8 = vector.shape_cast %7 : vector<8x256x256xf32> to vector<2048x256xf32>
    %c0_6 = arith.constant 0 : index
    %c0_7 = arith.constant 0 : index
    %9 = vector.load %arg4[%c0_6, %c0_7] : memref<2048x256xf32, #tpu.memory_space<vmem>>, vector<2048x256xf32>
    tpu.vector_store %arg4[%c0_6, %c0_7], %8 {strides = array<i32>} : memref<2048x256xf32, #tpu.memory_space<vmem>>, vector<2048x256xf32>,
    return
  }
  func.func @transform_0(%arg0: i32) -> (i32, i32) {
    %c0_i32 = arith.constant 0 : i32
    %c0_i32_0 = arith.constant 0 : i32
    %c0_i32_1 = arith.constant 0 : i32
    return %c0_i32, %c0_i32_0 : i32, i32
  }
  func.func @transform_1(%arg0: i32) -> (i32, i32) {
    %c0_i32 = arith.constant 0 : i32
    %c0_i32_0 = arith.constant 0 : i32
    %c0_i32_1 = arith.constant 0 : i32
    return %c0_i32, %c0_i32_0 : i32, i32
  }
  func.func @transform_2(%arg0: i32) -> (i32, i32) {
    %c0_i32 = arith.constant 0 : i32
    %c0_i32_0 = arith.constant 0 : i32
    return %arg0, %c0_i32 : i32, i32
  }
  func.func @transform_3(%arg0: i32) -> (i32, i32) {
    %c0_i32 = arith.constant 0 : i32
    %c0_i32_0 = arith.constant 0 : i32
    return %arg0, %c0_i32 : i32, i32
  }
}

</mosaic_0001>

<bundles_post_ra>
// kernel: decoder_forward.1
= control target key start
LH: loop header
LB: loop body
LE: loop exit
PB: predicated region body
PF: predicated region fallthrough
CT: control target
= control target key end

     0   :  { %8 = vsyncpa [#allocation3], 0  ;;  %s4673_s0 = inlined_call_operand.hbm [shape: f32[256,16], index: 0, kind: input, shape index: {}]   ;;  %s4674_s1 = inlined_call_operand.hbm [shape: f32[16,256], index: 1, kind: input, shape index: {}]   ;;  %s4675_s2 = inlined_call_operand.hbm [shape: f32[128,16], index: 2, kind: input, shape index: {}]   ;;  %s4676_s3 = inlined_call_operand.hbm [shape: f32[2048,256], index: 3, kind: output, shape index: {}]  }
   0x1   :  { %9 = vsyncpa [#allocation6], 0  ;;  %s28_s14 = sshll.u32 %s4674_s1, 4  ;;  %s29_s14 = int_to_ptr.hbm [resolvable:$true] %s28_s14 }
   0x2   :  { %10 = vsyncpa [#allocation4], 0  ;;  %s3419_s15 = smov [#allocation5]   ;;  %s15_s19 = sshll.u32 %s4673_s0, 4  ;;  %s16_s19 = int_to_ptr.hbm [resolvable:$true] %s15_s19 }
   0x3   :  { %s30_s16 = sshll.u32 %s3419_s15, 4  ;;  %s3420_s20 = smov 256   ;;  %s31_s16 = int_to_ptr.vmem [resolvable:$true] %s30_s16 }
   0x4   :  { %s3421_s21 = smov 16   ;;  %s3422_s22 = smov [#allocation2]  }
   0x5   :  { %36 = dma.hbm_to_vmem [thread:$0]  %s29_s14, 512, %s31_s16, [#allocation6], %s3420_s20, %s3420_s20, %s3421_s21  }
   0x6   :  { %s17_s23 = sshll.u32 %s3422_s22, 4  ;;  %s3423_s1 = smov 128   ;;  %s18_s23 = int_to_ptr.vmem [resolvable:$true] %s17_s23 }
   0x7   :  { %s3424_s24 = smov 8   ;;  %s41_s27 = sshll.u32 %s4675_s2, 4  ;;  %s42_s27 = int_to_ptr.hbm [resolvable:$true] %s41_s27 }
   0x8   :  { %23 = dma.hbm_to_vmem [thread:$0]  %s16_s19, 4096, %s18_s23, [#allocation3], %s3423_s1, %s3423_s1, %s3424_s24  }
   0x9   :  { %s3425_s28 = smov [#allocation7]  }
   0xa   :  { %s43_s0 = sshll.u32 %s3425_s28, 4  ;;  %s44_s0 = int_to_ptr.vmem [resolvable:$true] %s43_s0 }
   0xb   :  { %49 = dma.hbm_to_vmem [thread:$0]  %s42_s27, 2048, %s44_s0, [#allocation6], %s3423_s1, %s3423_s1, %s3424_s24  }
   0xc   :  { %3413 = dma.done.wait [#allocation3], 4096  }
   0xd   :  { %3414 = vsyncadd [#allocation3], 4294963200 }
   0xe   :  { %3415 = dma.done.wait [#allocation6], 2560  }
   0xf   :  { %3416 = vsyncadd [#allocation6], 4294964736  ;;  %v80_v0 = vld [vmem:[#allocation5 + $0x10] sm:$0xff]  ;;  %v81_v1 = vld [vmem:[#allocation5 + $0x18] sm:$0xff]  ;;  %vm82_vm0 = vcmask 130048   ;;  %s3426_s2 = smov [#allocation8]  }
  0x10   :  { %v78_v2 = vld [vmem:[#allocation5] sm:$0xff]  ;;  %145 = vmatpush.msra.mxu0 %v80_v0  ;;  %210 = vmatpush.msra.mxu1 %v81_v1  ;;  %v79_v3 = vld [vmem:[#allocation5 + $0x8] sm:$0xff]  ;;  %v64_v6 = vld [vmem:[#allocation7 + $0x10] sm:$0xff]  ;;  %s2713_s29 = sshll.u32 %s3426_s2, 4  ;;  %s2715_s5 = sshll.u32 %s4676_s3, 4  ;;  %s2714_s29 = int_to_ptr.vmem [resolvable:$true] %s2713_s29  ;;  %s2716_s5 = int_to_ptr.hbm [resolvable:$true] %s2715_s5 }
  0x11   :  { %v62_v4 = vld [vmem:[#allocation7] sm:$0xff]  ;;  %3273 = vmatpush.msra.mxu2 %v80_v0  ;;  %3275 = vmatpush.msra.mxu3 %v81_v1  ;;  %v63_v5 = vld [vmem:[#allocation7 + $0x8] sm:$0xff]  ;;  %v65_v8 = vld [vmem:[#allocation7 + $0x18] sm:$0xff] }
  0x12   :  { %146 = vmatpush.msra.mxu0 %v78_v2  ;;  %211 = vmatpush.msra.mxu1 %v79_v3  ;;  %v70_v7 = vld [vmem:[#allocation7 + $0x40] sm:$0xff]  ;;  %v71_v9 = vld [vmem:[#allocation7 + $0x48] sm:$0xff]  ;;  %v72_v11 = vld [vmem:[#allocation7 + $0x50] sm:$0xff] }
  0x13   :  { %2729 = vmatmul.msk.f32.vlgmr.msra.gmra.mxu0 %vm82_vm0, %v62_v4  ;;  %2745 = vmatmul.msk.f32.vlgmr.msra.gmra.mxu1 %vm82_vm0, %v62_v4  ;;  %v66_v10 = vld [vmem:[#allocation7 + $0x20] sm:$0xff]  ;;  %v67_v12 = vld [vmem:[#allocation7 + $0x28] sm:$0xff]  ;;  %v73_v13 = vld [vmem:[#allocation7 + $0x58] sm:$0xff] }
  0x14   :  { %3274 = vmatpush.msra.mxu2 %v78_v2  ;;  %3276 = vmatpush.msra.mxu3 %v79_v3  ;;  %v68_v14 = vld [vmem:[#allocation7 + $0x30] sm:$0xff]  ;;  %v74_v15 = vld [vmem:[#allocation7 + $0x60] sm:$0xff]  ;;  %v69_v16 = vld [vmem:[#allocation7 + $0x38] sm:$0xff] }
  0x15   :  { %2737 = vmatmul.msk.f32.vlgmr.msra.gmra.mxu2 %vm82_vm0, %v70_v7  ;;  %2753 = vmatmul.msk.f32.vlgmr.msra.gmra.mxu3 %vm82_vm0, %v70_v7  ;;  %v75_v17 = vld [vmem:[#allocation7 + $0x68] sm:$0xff]  ;;  %v76_v18 = vld [vmem:[#allocation7 + $0x70] sm:$0xff]  ;;  %v77_v19 = vld [vmem:[#allocation7 + $0x78] sm:$0xff] }
  0x16   :  { %v3491_v24 = vld [vmem:[#allocation2] sm:$0xff]  ;;  %v3497_v27 = vld [vmem:[#allocation2 + $0x8] sm:$0xff]  ;;  %v3503_v30 = vld [vmem:[#allocation2 + $0x10] sm:$0xff] }
  0x17   :  { %v3513_v33 = vld [vmem:[#allocation2 + $0x18] sm:$0xff]  ;;  %v3523_v36 = vld [vmem:[#allocation2 + $0x20] sm:$0xff]  ;;  %v3533_v39 = vld [vmem:[#allocation2 + $0x28] sm:$0xff] }
  0x18   :  { %v3543_v44 = vld [vmem:[#allocation2 + $0x30] sm:$0xff]  ;;  %v3553_v47 = vld [vmem:[#allocation2 + $0x38] sm:$0xff]  ;;  %v3563_v50 = vld [vmem:[#allocation2 + $0x40] sm:$0xff] }
  0x19   :  { %v3573_v53 = vld [vmem:[#allocation2 + $0x48] sm:$0xff]  ;;  %v3583_v54 = vld [vmem:[#allocation2 + $0x50] sm:$0xff]  ;;  %v3593_v55 = vld [vmem:[#allocation2 + $0x58] sm:$0xff] }
  0x1a   :  { %v3607_v58 = vld [vmem:[#allocation2 + $0x60] sm:$0xff]  ;;  %v3617_v59 = vld [vmem:[#allocation2 + $0x68] sm:$0xff]  ;;  %v3631_v62 = vld [vmem:[#allocation2 + $0x70] sm:$0xff] }
  0x1b   :  { %2730 = vmatmul.msk.f32.gmra.mxu0 %vm82_vm0, %v63_v5  ;;  %2746 = vmatmul.msk.f32.gmra.mxu1 %vm82_vm0, %v63_v5  ;;  %v3645_v1 = vld [vmem:[#allocation2 + $0x78] sm:$0xff]  ;;  %v3659_v4 = vld [vmem:[#allocation2 + $0x80] sm:$0xff]  ;;  %v3669_v7 = vld [vmem:[#allocation2 + $0x88] sm:$0xff] }
  0x1d   :  { %2738 = vmatmul.msk.f32.gmra.mxu2 %vm82_vm0, %v71_v9  ;;  %2754 = vmatmul.msk.f32.gmra.mxu3 %vm82_vm0, %v71_v9 }
  0x23   :  { %2731 = vmatmul.msk.f32.gmra.mxu0 %vm82_vm0, %v64_v6  ;;  %2747 = vmatmul.msk.f32.gmra.mxu1 %vm82_vm0, %v64_v6 }
  0x25   :  { %2739 = vmatmul.msk.f32.gmra.mxu2 %vm82_vm0, %v72_v11  ;;  %2755 = vmatmul.msk.f32.gmra.mxu3 %vm82_vm0, %v72_v11 }
  0x2b   :  { %2732 = vmatmul.msk.f32.gmra.mxu0 %vm82_vm0, %v65_v8  ;;  %2748 = vmatmul.msk.f32.gmra.mxu1 %vm82_vm0, %v65_v8 }
  0x2d   :  { %2740 = vmatmul.msk.f32.gmra.mxu2 %vm82_vm0, %v73_v13  ;;  %2756 = vmatmul.msk.f32.gmra.mxu3 %vm82_vm0, %v73_v13 }
  0x33   :  { %2733 = vmatmul.msk.f32.gmra.mxu0 %vm82_vm0, %v66_v10  ;;  %2749 = vmatmul.msk.f32.gmra.mxu1 %vm82_vm0, %v66_v10  ;;  %v3679_v10 = vld [vmem:[#allocation2 + $0x90] sm:$0xff] }
  0x35   :  { %2741 = vmatmul.msk.f32.gmra.mxu2 %vm82_vm0, %v74_v15  ;;  %2757 = vmatmul.msk.f32.gmra.mxu3 %vm82_vm0, %v74_v15  ;;  %v3689_v15 = vld [vmem:[#allocation2 + $0x98] sm:$0xff] }
  0x3b   :  { %2734 = vmatmul.msk.f32.gmra.mxu0 %vm82_vm0, %v67_v12  ;;  %2750 = vmatmul.msk.f32.gmra.mxu1 %vm82_vm0, %v67_v12 }
  0x3d   :  { %2742 = vmatmul.msk.f32.gmra.mxu2 %vm82_vm0, %v75_v17  ;;  %2758 = vmatmul.msk.f32.gmra.mxu3 %vm82_vm0, %v75_v17 }
  0x43   :  { %2735 = vmatmul.msk.f32.gmra.mxu0 %vm82_vm0, %v68_v14  ;;  %2751 = vmatmul.msk.f32.gmra.mxu1 %vm82_vm0, %v68_v14 }
  0x45   :  { %2743 = vmatmul.msk.f32.gmra.mxu2 %vm82_vm0, %v76_v18  ;;  %2759 = vmatmul.msk.f32.gmra.mxu3 %vm82_vm0, %v76_v18 }
  0x4b   :  { %2736 = vmatmul.msk.f32.gmra.mxu0 %vm82_vm0, %v69_v16  ;;  %2752 = vmatmul.msk.f32.gmra.mxu1 %vm82_vm0, %v69_v16 }
  0x4d   :  { %2744 = vmatmul.msk.f32.gmra.mxu2 %vm82_vm0, %v77_v19  ;;  %2760 = vmatmul.msk.f32.gmra.mxu3 %vm82_vm0, %v77_v19 }
  0x90   :  { %v148_v20 = vpop.f32.mrf.mxu0  ;;  %v213_v21 = vpop.f32.mrf.mxu1 }
  0x98   :  { %v151_v22 = vpop.f32.mrf.mxu0  ;;  %v216_v23 = vpop.f32.mrf.mxu1 }
  0x99   :  { %403 = vmatpush.msrb.mxu2 %v151_v22  ;;  %516 = vmatpush.msrb.mxu3 %v216_v23  ;;  %v172_v40 = vpop.f32.mrf.mxu2  ;;  %v237_v41 = vpop.f32.mrf.mxu3 }
  0x9b   :  { %404 = vmatpush.msrb.mxu2 %v148_v20  ;;  %517 = vmatpush.msrb.mxu3 %v213_v21  ;;  %v3699_v20 = vld [vmem:[#allocation2 + $0xa0] sm:$0xff] }
  0x9c   :  { %2761 = vmatmul.msk.f32.vlgmr.msrb.gmra.mxu2 %vm82_vm0, %v3491_v24  ;;  %2793 = vmatmul.msk.f32.vlgmr.msrb.gmra.mxu3 %vm82_vm0, %v3491_v24 }
  0xa0   :  { %v154_v25 = vpop.f32.mrf.mxu0  ;;  %v219_v26 = vpop.f32.mrf.mxu1 }
  0xa1   :  { %v175_v45 = vpop.f32.mrf.mxu2  ;;  %v240_v46 = vpop.f32.mrf.mxu3 }
  0xa4   :  { %2762 = vmatmul.msk.f32.gmra.mxu2 %vm82_vm0, %v3497_v27  ;;  %2794 = vmatmul.msk.f32.gmra.mxu3 %vm82_vm0, %v3497_v27 }
  0xa8   :  { %v157_v28 = vpop.f32.mrf.mxu0  ;;  %v222_v29 = vpop.f32.mrf.mxu1 }
  0xa9   :  { %629 = vmatpush.msrb.mxu0 %v157_v28  ;;  %742 = vmatpush.msrb.mxu1 %v222_v29  ;;  %v178_v48 = vpop.f32.mrf.mxu2  ;;  %v243_v49 = vpop.f32.mrf.mxu3 }
  0xab   :  { %630 = vmatpush.msrb.mxu0 %v154_v25  ;;  %743 = vmatpush.msrb.mxu1 %v219_v26  ;;  %v3709_v26 = vld [vmem:[#allocation2 + $0xa8] sm:$0xff] }
  0xac   :  { %2763 = vmatmul.msk.f32.gmra.mxu2 %vm82_vm0, %v3503_v30  ;;  %2795 = vmatmul.msk.f32.gmra.mxu3 %vm82_vm0, %v3503_v30 }
  0xad   :  { %2825 = vmatmul.msk.f32.vlgmr.msrb.gmra.mxu0 %vm82_vm0, %v3491_v24  ;;  %2857 = vmatmul.msk.f32.vlgmr.msrb.gmra.mxu1 %vm82_vm0, %v3491_v24 }
  0xb0   :  { %v160_v31 = vpop.f32.mrf.mxu0  ;;  %v225_v32 = vpop.f32.mrf.mxu1 }
  0xb1   :  { %v181_v51 = vpop.f32.mrf.mxu2  ;;  %v246_v52 = vpop.f32.mrf.mxu3 }
  0xb4   :  { %2764 = vmatmul.msk.f32.gmra.mxu2 %vm82_vm0, %v3513_v33  ;;  %2796 = vmatmul.msk.f32.gmra.mxu3 %vm82_vm0, %v3513_v33 }
  0xb5   :  { %2826 = vmatmul.msk.f32.gmra.mxu0 %vm82_vm0, %v3497_v27  ;;  %2858 = vmatmul.msk.f32.gmra.mxu1 %vm82_vm0, %v3497_v27 }
  0xb8   :  { %v163_v34 = vpop.f32.mrf.mxu0  ;;  %v228_v35 = vpop.f32.mrf.mxu1 }
  0xb9   :  { %855 = vmatpush.msra.mxu2 %v163_v34  ;;  %968 = vmatpush.msra.mxu3 %v228_v35  ;;  %v3603_v56 = vpop.f32.mrf.mxu2  ;;  %v3605_v57 = vpop.f32.mrf.mxu3  ;;  %v3719_v34 = vld [vmem:[#allocation2 + $0xb0] sm:$0xff] }
  0xbb   :  { %856 = vmatpush.msra.mxu2 %v160_v31  ;;  %969 = vmatpush.msra.mxu3 %v225_v32 }
  0xbc   :  { %2765 = vmatmul.msk.f32.gmra.mxu2 %vm82_vm0, %v3523_v36  ;;  %2797 = vmatmul.msk.f32.gmra.mxu3 %vm82_vm0, %v3523_v36 }
  0xbd   :  { %2827 = vmatmul.msk.f32.gmra.mxu0 %vm82_vm0, %v3503_v30  ;;  %2859 = vmatmul.msk.f32.gmra.mxu1 %vm82_vm0, %v3503_v30 }
  0xbe   :  { %1307 = vmatpush.msrb.mxu2 %v175_v45  ;;  %1420 = vmatpush.msrb.mxu3 %v240_v46 }
  0xc0   :  { %v166_v37 = vpop.f32.mrf.mxu0  ;;  %v231_v38 = vpop.f32.mrf.mxu1  ;;  %1308 = vmatpush.msrb.mxu2 %v172_v40  ;;  %1421 = vmatpush.msrb.mxu3 %v237_v41  ;;  %v3729_v41 = vld [vmem:[#allocation2 + $0xb8] sm:$0xff] }
  0xc1   :  { %v3619_v60 = vpop.f32.mrf.mxu2  ;;  %v3621_v61 = vpop.f32.mrf.mxu3 }
  0xc4   :  { %2766 = vmatmul.msk.f32.gmra.mxu2 %vm82_vm0, %v3533_v39  ;;  %2798 = vmatmul.msk.f32.gmra.mxu3 %vm82_vm0, %v3533_v39 }
  0xc5   :  { %2828 = vmatmul.msk.f32.gmra.mxu0 %vm82_vm0, %v3513_v33  ;;  %2860 = vmatmul.msk.f32.gmra.mxu1 %vm82_vm0, %v3513_v33 }
  0xc8   :  { %v169_v42 = vpop.f32.mrf.mxu0  ;;  %v234_v43 = vpop.f32.mrf.mxu1 }
  0xc9   :  { %1081 = vmatpush.msra.mxu0 %v169_v42  ;;  %1194 = vmatpush.msra.mxu1 %v234_v43  ;;  %v3633_v63 = vpop.f32.mrf.mxu2  ;;  %v3635_v0 = vpop.f32.mrf.mxu3 }
  0xcb   :  { %1082 = vmatpush.msra.mxu0 %v166_v37  ;;  %1195 = vmatpush.msra.mxu1 %v231_v38 }
  0xcc   :  { %2767 = vmatmul.msk.f32.gmra.mxu2 %vm82_vm0, %v3543_v44  ;;  %2799 = vmatmul.msk.f32.gmra.mxu3 %vm82_vm0, %v3543_v44 }
  0xcd   :  { %2829 = vmatmul.msk.f32.gmra.mxu0 %vm82_vm0, %v3523_v36  ;;  %2861 = vmatmul.msk.f32.gmra.mxu1 %vm82_vm0, %v3523_v36 }
  0xce   :  { %1533 = vmatpush.msrb.mxu0 %v181_v51  ;;  %1646 = vmatpush.msrb.mxu1 %v246_v52 }
  0xd0   :  { %1534 = vmatpush.msrb.mxu0 %v178_v48  ;;  %1647 = vmatpush.msrb.mxu1 %v243_v49  ;;  %v3739_v48 = vld [vmem:[#allocation2 + $0xc0] sm:$0xff] }
  0xd1   :  { %v3655_v2 = vpop.f32.mrf.mxu2  ;;  %v3657_v3 = vpop.f32.mrf.mxu3 }
  0xd4   :  { %2768 = vmatmul.msk.f32.gmra.mxu2 %vm82_vm0, %v3553_v47  ;;  %2800 = vmatmul.msk.f32.gmra.mxu3 %vm82_vm0, %v3553_v47 }
  0xd5   :  { %2830 = vmatmul.msk.f32.gmra.mxu0 %vm82_vm0, %v3533_v39  ;;  %2862 = vmatmul.msk.f32.gmra.mxu1 %vm82_vm0, %v3533_v39 }
  0xdc   :  { %2769 = vmatmul.msk.f32.gmra.mxu2 %vm82_vm0, %v3563_v50  ;;  %2801 = vmatmul.msk.f32.gmra.mxu3 %vm82_vm0, %v3563_v50 }
  0xdd   :  { %2831 = vmatmul.msk.f32.gmra.mxu0 %vm82_vm0, %v3543_v44  ;;  %2863 = vmatmul.msk.f32.gmra.mxu1 %vm82_vm0, %v3543_v44 }
  0xe4   :  { %2770 = vmatmul.msk.f32.gmra.mxu2 %vm82_vm0, %v3573_v53  ;;  %2802 = vmatmul.msk.f32.gmra.mxu3 %vm82_vm0, %v3573_v53 }
  0xe5   :  { %2832 = vmatmul.msk.f32.gmra.mxu0 %vm82_vm0, %v3553_v47  ;;  %2864 = vmatmul.msk.f32.gmra.mxu1 %vm82_vm0, %v3553_v47 }
  0xec   :  { %2771 = vmatmul.msk.f32.gmra.mxu2 %vm82_vm0, %v3583_v54  ;;  %2803 = vmatmul.msk.f32.gmra.mxu3 %vm82_vm0, %v3583_v54 }
  0xed   :  { %2833 = vmatmul.msk.f32.gmra.mxu0 %vm82_vm0, %v3563_v50  ;;  %2865 = vmatmul.msk.f32.gmra.mxu1 %vm82_vm0, %v3563_v50 }
  0xf4   :  { %2772 = vmatmul.msk.f32.gmra.mxu2 %vm82_vm0, %v3593_v55  ;;  %2804 = vmatmul.msk.f32.gmra.mxu3 %vm82_vm0, %v3593_v55 }
  0xf5   :  { %2834 = vmatmul.msk.f32.gmra.mxu0 %vm82_vm0, %v3573_v53  ;;  %2866 = vmatmul.msk.f32.gmra.mxu1 %vm82_vm0, %v3573_v53 }
  0xfc   :  { %2773 = vmatmul.msk.f32.gmra.mxu2 %vm82_vm0, %v3607_v58  ;;  %2805 = vmatmul.msk.f32.gmra.mxu3 %vm82_vm0, %v3607_v58 }
  0xfd   :  { %2835 = vmatmul.msk.f32.gmra.mxu0 %vm82_vm0, %v3583_v54  ;;  %2867 = vmatmul.msk.f32.gmra.mxu1 %vm82_vm0, %v3583_v54 }
 0x104   :  { %2774 = vmatmul.msk.f32.gmra.mxu2 %vm82_vm0, %v3617_v59  ;;  %2806 = vmatmul.msk.f32.gmra.mxu3 %vm82_vm0, %v3617_v59 }
 0x105   :  { %2836 = vmatmul.msk.f32.gmra.mxu0 %vm82_vm0, %v3593_v55  ;;  %2868 = vmatmul.msk.f32.gmra.mxu1 %vm82_vm0, %v3593_v55 }
 0x10c   :  { %2775 = vmatmul.msk.f32.gmra.mxu2 %vm82_vm0, %v3631_v62  ;;  %2807 = vmatmul.msk.f32.gmra.mxu3 %vm82_vm0, %v3631_v62 }
 0x10d   :  { %2837 = vmatmul.msk.f32.gmra.mxu0 %vm82_vm0, %v3607_v58  ;;  %2869 = vmatmul.msk.f32.gmra.mxu1 %vm82_vm0, %v3607_v58 }
 0x114   :  { %2776 = vmatmul.msk.f32.gmra.mxu2 %vm82_vm0, %v3645_v1  ;;  %2808 = vmatmul.msk.f32.gmra.mxu3 %vm82_vm0, %v3645_v1 }
 0x115   :  { %2838 = vmatmul.msk.f32.gmra.mxu0 %vm82_vm0, %v3617_v59  ;;  %2870 = vmatmul.msk.f32.gmra.mxu1 %vm82_vm0, %v3617_v59 }
 0x11c   :  { %2777 = vmatmul.msk.f32.gmra.mxu2 %vm82_vm0, %v3659_v4  ;;  %2809 = vmatmul.msk.f32.gmra.mxu3 %vm82_vm0, %v3659_v4 }
 0x11d   :  { %2839 = vmatmul.msk.f32.gmra.mxu0 %vm82_vm0, %v3631_v62  ;;  %2871 = vmatmul.msk.f32.gmra.mxu1 %vm82_vm0, %v3631_v62 }
 0x11f   :  { %v406_v5 = vpop.f32.mrf.mxu2  ;;  %v519_v6 = vpop.f32.mrf.mxu3 }
 0x120   :  { %2197 = vst [vmem:[#allocation8] sm:$0xff] %v406_v5 }
 0x121   :  { %2198 = vst [vmem:[#allocation8 + $0x8] sm:$0xff] %v519_v6  ;;  %v3749_v6 = vld [vmem:[#allocation2 + $0xc8] sm:$0xff] }
 0x124   :  { %2778 = vmatmul.msk.f32.gmra.mxu2 %vm82_vm0, %v3669_v7  ;;  %2810 = vmatmul.msk.f32.gmra.mxu3 %vm82_vm0, %v3669_v7 }
 0x125   :  { %2840 = vmatmul.msk.f32.gmra.mxu0 %vm82_vm0, %v3645_v1  ;;  %2872 = vmatmul.msk.f32.gmra.mxu1 %vm82_vm0, %v3645_v1 }
 0x127   :  { %v409_v8 = vpop.f32.mrf.mxu2  ;;  %v522_v9 = vpop.f32.mrf.mxu3 }
 0x128   :  { %2199 = vst [vmem:[#allocation8 + $0x10] sm:$0xff] %v409_v8 }
 0x129   :  { %2200 = vst [vmem:[#allocation8 + $0x18] sm:$0xff] %v522_v9 }
 0x12a   :  { %v632_v11 = vpop.f32.mrf.mxu0  ;;  %v745_v12 = vpop.f32.mrf.mxu1 }
 0x12b   :  { %2261 = vst [vmem:[#allocation8 + $0x200] sm:$0xff] %v632_v11 }
 0x12c   :  { %2779 = vmatmul.msk.f32.gmra.mxu2 %vm82_vm0, %v3679_v10  ;;  %2811 = vmatmul.msk.f32.gmra.mxu3 %vm82_vm0, %v3679_v10  ;;  %2262 = vst [vmem:[#allocation8 + $0x208] sm:$0xff] %v745_v12 }
 0x12d   :  { %2841 = vmatmul.msk.f32.gmra.mxu0 %vm82_vm0, %v3659_v4  ;;  %2873 = vmatmul.msk.f32.gmra.mxu1 %vm82_vm0, %v3659_v4 }
 0x12f   :  { %v412_v13 = vpop.f32.mrf.mxu2  ;;  %v525_v14 = vpop.f32.mrf.mxu3 }
 0x130   :  { %2201 = vst [vmem:[#allocation8 + $0x20] sm:$0xff] %v412_v13  ;;  %v3759_v13 = vld [vmem:[#allocation2 + $0xd0] sm:$0xff] }
 0x131   :  { %2202 = vst [vmem:[#allocation8 + $0x28] sm:$0xff] %v525_v14 }
 0x132   :  { %v635_v16 = vpop.f32.mrf.mxu0  ;;  %v748_v17 = vpop.f32.mrf.mxu1 }
 0x133   :  { %2263 = vst [vmem:[#allocation8 + $0x210] sm:$0xff] %v635_v16 }
 0x134   :  { %2780 = vmatmul.msk.f32.gmra.mxu2 %vm82_vm0, %v3689_v15  ;;  %2812 = vmatmul.msk.f32.gmra.mxu3 %vm82_vm0, %v3689_v15  ;;  %2264 = vst [vmem:[#allocation8 + $0x218] sm:$0xff] %v748_v17 }
 0x135   :  { %2842 = vmatmul.msk.f32.gmra.mxu0 %vm82_vm0, %v3669_v7  ;;  %2874 = vmatmul.msk.f32.gmra.mxu1 %vm82_vm0, %v3669_v7 }
 0x137   :  { %v415_v18 = vpop.f32.mrf.mxu2  ;;  %v528_v19 = vpop.f32.mrf.mxu3 }
 0x138   :  { %2203 = vst [vmem:[#allocation8 + $0x30] sm:$0xff] %v415_v18 }
 0x139   :  { %2204 = vst [vmem:[#allocation8 + $0x38] sm:$0xff] %v528_v19  ;;  %v3769_v19 = vld [vmem:[#allocation2 + $0xd8] sm:$0xff] }
 0x13a   :  { %v638_v21 = vpop.f32.mrf.mxu0  ;;  %v751_v22 = vpop.f32.mrf.mxu1 }
 0x13b   :  { %2265 = vst [vmem:[#allocation8 + $0x220] sm:$0xff] %v638_v21 }
 0x13c   :  { %2781 = vmatmul.msk.f32.gmra.mxu2 %vm82_vm0, %v3699_v20  ;;  %2813 = vmatmul.msk.f32.gmra.mxu3 %vm82_vm0, %v3699_v20  ;;  %2266 = vst [vmem:[#allocation8 + $0x228] sm:$0xff] %v751_v22 }
 0x13d   :  { %2843 = vmatmul.msk.f32.gmra.mxu0 %vm82_vm0, %v3679_v10  ;;  %2875 = vmatmul.msk.f32.gmra.mxu1 %vm82_vm0, %v3679_v10 }
 0x13f   :  { %v418_v23 = vpop.f32.mrf.mxu2  ;;  %v531_v25 = vpop.f32.mrf.mxu3 }
 0x140   :  { %2205 = vst [vmem:[#allocation8 + $0x40] sm:$0xff] %v418_v23 }
 0x141   :  { %2206 = vst [vmem:[#allocation8 + $0x48] sm:$0xff] %v531_v25 }
 0x142   :  { %v641_v28 = vpop.f32.mrf.mxu0  ;;  %v754_v29 = vpop.f32.mrf.mxu1 }
 0x143   :  { %2267 = vst [vmem:[#allocation8 + $0x230] sm:$0xff] %v641_v28  ;;  %v3779_v28 = vld [vmem:[#allocation2 + $0xe0] sm:$0xff] }
 0x144   :  { %2782 = vmatmul.msk.f32.gmra.mxu2 %vm82_vm0, %v3709_v26  ;;  %2814 = vmatmul.msk.f32.gmra.mxu3 %vm82_vm0, %v3709_v26  ;;  %2268 = vst [vmem:[#allocation8 + $0x238] sm:$0xff] %v754_v29 }
 0x145   :  { %2844 = vmatmul.msk.f32.gmra.mxu0 %vm82_vm0, %v3689_v15  ;;  %2876 = vmatmul.msk.f32.gmra.mxu1 %vm82_vm0, %v3689_v15 }
 0x147   :  { %v421_v31 = vpop.f32.mrf.mxu2  ;;  %v534_v32 = vpop.f32.mrf.mxu3 }
 0x148   :  { %2207 = vst [vmem:[#allocation8 + $0x50] sm:$0xff] %v421_v31 }
 0x149   :  { %2208 = vst [vmem:[#allocation8 + $0x58] sm:$0xff] %v534_v32 }
 0x14a   :  { %v644_v35 = vpop.f32.mrf.mxu0  ;;  %v757_v37 = vpop.f32.mrf.mxu1 }
 0x14b   :  { %2269 = vst [vmem:[#allocation8 + $0x240] sm:$0xff] %v644_v35 }
 0x14c   :  { %2783 = vmatmul.msk.f32.gmra.mxu2 %vm82_vm0, %v3719_v34  ;;  %2815 = vmatmul.msk.f32.gmra.mxu3 %vm82_vm0, %v3719_v34  ;;  %2270 = vst [vmem:[#allocation8 + $0x248] sm:$0xff] %v757_v37  ;;  %v3789_v37 = vld [vmem:[#allocation2 + $0xe8] sm:$0xff] }
 0x14d   :  { %2845 = vmatmul.msk.f32.gmra.mxu0 %vm82_vm0, %v3699_v20  ;;  %2877 = vmatmul.msk.f32.gmra.mxu1 %vm82_vm0, %v3699_v20 }
 0x14f   :  { %v424_v38 = vpop.f32.mrf.mxu2  ;;  %v537_v40 = vpop.f32.mrf.mxu3 }
 0x150   :  { %2209 = vst [vmem:[#allocation8 + $0x60] sm:$0xff] %v424_v38 }
 0x151   :  { %2210 = vst [vmem:[#allocation8 + $0x68] sm:$0xff] %v537_v40 }
 0x152   :  { %v647_v42 = vpop.f32.mrf.mxu0  ;;  %v760_v43 = vpop.f32.mrf.mxu1 }
 0x153   :  { %2271 = vst [vmem:[#allocation8 + $0x250] sm:$0xff] %v647_v42 }
 0x154   :  { %2784 = vmatmul.msk.f32.gmra.mxu2 %vm82_vm0, %v3729_v41  ;;  %2816 = vmatmul.msk.f32.gmra.mxu3 %vm82_vm0, %v3729_v41  ;;  %2272 = vst [vmem:[#allocation8 + $0x258] sm:$0xff] %v760_v43 }
 0x155   :  { %2846 = vmatmul.msk.f32.gmra.mxu0 %vm82_vm0, %v3709_v26  ;;  %2878 = vmatmul.msk.f32.gmra.mxu1 %vm82_vm0, %v3709_v26 }
 0x157   :  { %v427_v45 = vpop.f32.mrf.mxu2  ;;  %v540_v46 = vpop.f32.mrf.mxu3 }
 0x158   :  { %2211 = vst [vmem:[#allocation8 + $0x70] sm:$0xff] %v427_v45  ;;  %v3799_v45 = vld [vmem:[#allocation2 + $0xf0] sm:$0xff] }
 0x159   :  { %2212 = vst [vmem:[#allocation8 + $0x78] sm:$0xff] %v540_v46 }
 0x15a   :  { %v650_v49 = vpop.f32.mrf.mxu0  ;;  %v763_v51 = vpop.f32.mrf.mxu1 }
 0x15b   :  { %2273 = vst [vmem:[#allocation8 + $0x260] sm:$0xff] %v650_v49 }
 0x15c   :  { %2785 = vmatmul.msk.f32.gmra.mxu2 %vm82_vm0, %v3739_v48  ;;  %2817 = vmatmul.msk.f32.gmra.mxu3 %vm82_vm0, %v3739_v48  ;;  %2274 = vst [vmem:[#allocation8 + $0x268] sm:$0xff] %v763_v51 }
 0x15d   :  { %2847 = vmatmul.msk.f32.gmra.mxu0 %vm82_vm0, %v3719_v34  ;;  %2879 = vmatmul.msk.f32.gmra.mxu1 %vm82_vm0, %v3719_v34 }
 0x15f   :  { %v430_v52 = vpop.f32.mrf.mxu2  ;;  %v543_v5 = vpop.f32.mrf.mxu3 }
 0x160   :  { %2213 = vst [vmem:[#allocation8 + $0x80] sm:$0xff] %v430_v52 }
 0x161   :  { %2214 = vst [vmem:[#allocation8 + $0x88] sm:$0xff] %v543_v5  ;;  %v3809_v5 = vld [vmem:[#allocation2 + $0xf8] sm:$0xff] }
 0x162   :  { %v653_v8 = vpop.f32.mrf.mxu0  ;;  %v766_v9 = vpop.f32.mrf.mxu1 }
 0x163   :  { %2275 = vst [vmem:[#allocation8 + $0x270] sm:$0xff] %v653_v8 }
 0x164   :  { %2786 = vmatmul.msk.f32.gmra.mxu2 %vm82_vm0, %v3749_v6  ;;  %2818 = vmatmul.msk.f32.gmra.mxu3 %vm82_vm0, %v3749_v6  ;;  %2276 = vst [vmem:[#allocation8 + $0x278] sm:$0xff] %v766_v9 }
 0x165   :  { %2848 = vmatmul.msk.f32.gmra.mxu0 %vm82_vm0, %v3729_v41  ;;  %2880 = vmatmul.msk.f32.gmra.mxu1 %vm82_vm0, %v3729_v41 }
 0x167   :  { %v433_v11 = vpop.f32.mrf.mxu2  ;;  %v546_v12 = vpop.f32.mrf.mxu3 }
 0x168   :  { %2215 = vst [vmem:[#allocation8 + $0x90] sm:$0xff] %v433_v11 }
 0x169   :  { %2216 = vst [vmem:[#allocation8 + $0x98] sm:$0xff] %v546_v12 }
 0x16a   :  { %v656_v14 = vpop.f32.mrf.mxu0  ;;  %v769_v16 = vpop.f32.mrf.mxu1 }
 0x16b   :  { %2277 = vst [vmem:[#allocation8 + $0x280] sm:$0xff] %v656_v14 }
 0x16c   :  { %2787 = vmatmul.msk.f32.gmra.mxu2 %vm82_vm0, %v3759_v13  ;;  %2819 = vmatmul.msk.f32.gmra.mxu3 %vm82_vm0, %v3759_v13  ;;  %2278 = vst [vmem:[#allocation8 + $0x288] sm:$0xff] %v769_v16 }
 0x16d   :  { %2849 = vmatmul.msk.f32.gmra.mxu0 %vm82_vm0, %v3739_v48  ;;  %2881 = vmatmul.msk.f32.gmra.mxu1 %vm82_vm0, %v3739_v48 }
 0x16f   :  { %v436_v17 = vpop.f32.mrf.mxu2  ;;  %v549_v18 = vpop.f32.mrf.mxu3 }
 0x170   :  { %2217 = vst [vmem:[#allocation8 + $0xa0] sm:$0xff] %v436_v17 }
 0x171   :  { %2218 = vst [vmem:[#allocation8 + $0xa8] sm:$0xff] %v549_v18 }
 0x172   :  { %v659_v21 = vpop.f32.mrf.mxu0  ;;  %v772_v22 = vpop.f32.mrf.mxu1 }
 0x173   :  { %2279 = vst [vmem:[#allocation8 + $0x290] sm:$0xff] %v659_v21 }
 0x174   :  { %2788 = vmatmul.msk.f32.gmra.mxu2 %vm82_vm0, %v3769_v19  ;;  %2820 = vmatmul.msk.f32.gmra.mxu3 %vm82_vm0, %v3769_v19  ;;  %2280 = vst [vmem:[#allocation8 + $0x298] sm:$0xff] %v772_v22 }
 0x175   :  { %2850 = vmatmul.msk.f32.gmra.mxu0 %vm82_vm0, %v3749_v6  ;;  %2882 = vmatmul.msk.f32.gmra.mxu1 %vm82_vm0, %v3749_v6 }
 0x177   :  { %v439_v23 = vpop.f32.mrf.mxu2  ;;  %v552_v25 = vpop.f32.mrf.mxu3 }
 0x178   :  { %2219 = vst [vmem:[#allocation8 + $0xb0] sm:$0xff] %v439_v23 }
 0x179   :  { %2220 = vst [vmem:[#allocation8 + $0xb8] sm:$0xff] %v552_v25 }
 0x17a   :  { %v662_v29 = vpop.f32.mrf.mxu0  ;;  %v775_v31 = vpop.f32.mrf.mxu1 }
 0x17b   :  { %2281 = vst [vmem:[#allocation8 + $0x2a0] sm:$0xff] %v662_v29 }
 0x17c   :  { %2789 = vmatmul.msk.f32.gmra.mxu2 %vm82_vm0, %v3779_v28  ;;  %2821 = vmatmul.msk.f32.gmra.mxu3 %vm82_vm0, %v3779_v28  ;;  %2282 = vst [vmem:[#allocation8 + $0x2a8] sm:$0xff] %v775_v31 }
 0x17d   :  { %2851 = vmatmul.msk.f32.gmra.mxu0 %vm82_vm0, %v3759_v13  ;;  %2883 = vmatmul.msk.f32.gmra.mxu1 %vm82_vm0, %v3759_v13 }
 0x17f   :  { %v442_v32 = vpop.f32.mrf.mxu2  ;;  %v555_v35 = vpop.f32.mrf.mxu3 }
 0x180   :  { %2221 = vst [vmem:[#allocation8 + $0xc0] sm:$0xff] %v442_v32 }
 0x181   :  { %2222 = vst [vmem:[#allocation8 + $0xc8] sm:$0xff] %v555_v35 }
 0x182   :  { %v665_v38 = vpop.f32.mrf.mxu0  ;;  %v778_v40 = vpop.f32.mrf.mxu1 }
 0x183   :  { %2283 = vst [vmem:[#allocation8 + $0x2b0] sm:$0xff] %v665_v38 }
 0x184   :  { %2790 = vmatmul.msk.f32.gmra.mxu2 %vm82_vm0, %v3789_v37  ;;  %2822 = vmatmul.msk.f32.gmra.mxu3 %vm82_vm0, %v3789_v37  ;;  %2284 = vst [vmem:[#allocation8 + $0x2b8] sm:$0xff] %v778_v40 }
 0x185   :  { %2852 = vmatmul.msk.f32.gmra.mxu0 %vm82_vm0, %v3769_v19  ;;  %2884 = vmatmul.msk.f32.gmra.mxu1 %vm82_vm0, %v3769_v19 }
 0x187   :  { %v445_v42 = vpop.f32.mrf.mxu2  ;;  %v558_v43 = vpop.f32.mrf.mxu3 }
 0x188   :  { %2223 = vst [vmem:[#allocation8 + $0xd0] sm:$0xff] %v445_v42 }
 0x189   :  { %2224 = vst [vmem:[#allocation8 + $0xd8] sm:$0xff] %v558_v43 }
 0x18a   :  { %v668_v46 = vpop.f32.mrf.mxu0  ;;  %v781_v49 = vpop.f32.mrf.mxu1 }
 0x18b   :  { %2285 = vst [vmem:[#allocation8 + $0x2c0] sm:$0xff] %v668_v46 }
 0x18c   :  { %2791 = vmatmul.msk.f32.gmra.mxu2 %vm82_vm0, %v3799_v45  ;;  %2823 = vmatmul.msk.f32.gmra.mxu3 %vm82_vm0, %v3799_v45  ;;  %2286 = vst [vmem:[#allocation8 + $0x2c8] sm:$0xff] %v781_v49 }
 0x18d   :  { %2853 = vmatmul.msk.f32.gmra.mxu0 %vm82_vm0, %v3779_v28  ;;  %2885 = vmatmul.msk.f32.gmra.mxu1 %vm82_vm0, %v3779_v28 }
 0x18f   :  { %v448_v51 = vpop.f32.mrf.mxu2  ;;  %v561_v52 = vpop.f32.mrf.mxu3 }
 0x190   :  { %2225 = vst [vmem:[#allocation8 + $0xe0] sm:$0xff] %v448_v51 }
 0x191   :  { %2226 = vst [vmem:[#allocation8 + $0xe8] sm:$0xff] %v561_v52 }
 0x192   :  { %v671_v8 = vpop.f32.mrf.mxu0  ;;  %v784_v9 = vpop.f32.mrf.mxu1 }
 0x193   :  { %2287 = vst [vmem:[#allocation8 + $0x2d0] sm:$0xff] %v671_v8 }
 0x194   :  { %2792 = vmatmul.msk.f32.gmra.mxu2 %vm82_vm0, %v3809_v5  ;;  %2824 = vmatmul.msk.f32.gmra.mxu3 %vm82_vm0, %v3809_v5  ;;  %2288 = vst [vmem:[#allocation8 + $0x2d8] sm:$0xff] %v784_v9 }
 0x195   :  { %2854 = vmatmul.msk.f32.gmra.mxu0 %vm82_vm0, %v3789_v37  ;;  %2886 = vmatmul.msk.f32.gmra.mxu1 %vm82_vm0, %v3789_v37 }
 0x197   :  { %v451_v11 = vpop.f32.mrf.mxu2  ;;  %v564_v12 = vpop.f32.mrf.mxu3 }
 0x198   :  { %2227 = vst [vmem:[#allocation8 + $0xf0] sm:$0xff] %v451_v11 }
 0x199   :  { %2228 = vst [vmem:[#allocation8 + $0xf8] sm:$0xff] %v564_v12 }
 0x19a   :  { %v674_v14 = vpop.f32.mrf.mxu0  ;;  %v787_v16 = vpop.f32.mrf.mxu1 }
 0x19b   :  { %2289 = vst [vmem:[#allocation8 + $0x2e0] sm:$0xff] %v674_v14 }
 0x19c   :  { %2889 = vmatmul.msk.f32.vlgmr.msra.gmra.mxu2 %vm82_vm0, %v3491_v24  ;;  %2921 = vmatmul.msk.f32.vlgmr.msra.gmra.mxu3 %vm82_vm0, %v3491_v24  ;;  %2290 = vst [vmem:[#allocation8 + $0x2e8] sm:$0xff] %v787_v16 }
 0x19d   :  { %2855 = vmatmul.msk.f32.gmra.mxu0 %vm82_vm0, %v3799_v45  ;;  %2887 = vmatmul.msk.f32.gmra.mxu1 %vm82_vm0, %v3799_v45 }
 0x19e   :  { %1759 = vmatpush.msra.mxu2 %v3619_v60  ;;  %1872 = vmatpush.msra.mxu3 %v3621_v61 }
 0x19f   :  { %v454_v17 = vpop.f32.mrf.mxu2  ;;  %v567_v18 = vpop.f32.mrf.mxu3 }
 0x1a0   :  { %1760 = vmatpush.msra.mxu2 %v3603_v56  ;;  %1873 = vmatpush.msra.mxu3 %v3605_v57  ;;  %2229 = vst [vmem:[#allocation8 + $0x100] sm:$0xff] %v454_v17 }
 0x1a1   :  { %2230 = vst [vmem:[#allocation8 + $0x108] sm:$0xff] %v567_v18 }
 0x1a2   :  { %v677_v21 = vpop.f32.mrf.mxu0  ;;  %v790_v22 = vpop.f32.mrf.mxu1 }
 0x1a3   :  { %2291 = vst [vmem:[#allocation8 + $0x2f0] sm:$0xff] %v677_v21 }
 0x1a4   :  { %2292 = vst [vmem:[#allocation8 + $0x2f8] sm:$0xff] %v790_v22  ;;  %2890 = vmatmul.msk.f32.gmra.mxu2 %vm82_vm0, %v3497_v27  ;;  %2922 = vmatmul.msk.f32.gmra.mxu3 %vm82_vm0, %v3497_v27 }
 0x1a5   :  { %2856 = vmatmul.msk.f32.gmra.mxu0 %vm82_vm0, %v3809_v5  ;;  %2888 = vmatmul.msk.f32.gmra.mxu1 %vm82_vm0, %v3809_v5 }
 0x1a7   :  { %v457_v56 = vpop.f32.mrf.mxu2  ;;  %v570_v57 = vpop.f32.mrf.mxu3 }
 0x1a8   :  { %2231 = vst [vmem:[#allocation8 + $0x110] sm:$0xff] %v457_v56 }
 0x1a9   :  { %2232 = vst [vmem:[#allocation8 + $0x118] sm:$0xff] %v570_v57 }
 0x1aa   :  { %v680_v60 = vpop.f32.mrf.mxu0  ;;  %v793_v61 = vpop.f32.mrf.mxu1 }
 0x1ab   :  { %2293 = vst [vmem:[#allocation8 + $0x300] sm:$0xff] %v680_v60 }
 0x1ac   :  { %2294 = vst [vmem:[#allocation8 + $0x308] sm:$0xff] %v793_v61  ;;  %2891 = vmatmul.msk.f32.gmra.mxu2 %vm82_vm0, %v3503_v30  ;;  %2923 = vmatmul.msk.f32.gmra.mxu3 %vm82_vm0, %v3503_v30 }
 0x1ad   :  { %2953 = vmatmul.msk.f32.vlgmr.msra.gmra.mxu0 %vm82_vm0, %v3491_v24  ;;  %2985 = vmatmul.msk.f32.vlgmr.msra.gmra.mxu1 %vm82_vm0, %v3491_v24 }
 0x1ae   :  { %1985 = vmatpush.msra.mxu0 %v3655_v2  ;;  %2098 = vmatpush.msra.mxu1 %v3657_v3 }
 0x1af   :  { %v460_v23 = vpop.f32.mrf.mxu2  ;;  %v573_v25 = vpop.f32.mrf.mxu3 }
 0x1b0   :  { %1986 = vmatpush.msra.mxu0 %v3633_v63  ;;  %2099 = vmatpush.msra.mxu1 %v3635_v0  ;;  %2233 = vst [vmem:[#allocation8 + $0x120] sm:$0xff] %v460_v23 }
 0x1b1   :  { %2234 = vst [vmem:[#allocation8 + $0x128] sm:$0xff] %v573_v25 }
 0x1b2   :  { %v683_v29 = vpop.f32.mrf.mxu0  ;;  %v796_v31 = vpop.f32.mrf.mxu1 }
 0x1b3   :  { %2295 = vst [vmem:[#allocation8 + $0x310] sm:$0xff] %v683_v29 }
 0x1b4   :  { %2296 = vst [vmem:[#allocation8 + $0x318] sm:$0xff] %v796_v31  ;;  %2892 = vmatmul.msk.f32.gmra.mxu2 %vm82_vm0, %v3513_v33  ;;  %2924 = vmatmul.msk.f32.gmra.mxu3 %vm82_vm0, %v3513_v33 }
 0x1b5   :  { %2954 = vmatmul.msk.f32.gmra.mxu0 %vm82_vm0, %v3497_v27  ;;  %2986 = vmatmul.msk.f32.gmra.mxu1 %vm82_vm0, %v3497_v27 }
 0x1b7   :  { %v463_v24 = vpop.f32.mrf.mxu2  ;;  %v576_v63 = vpop.f32.mrf.mxu3 }
 0x1b8   :  { %2235 = vst [vmem:[#allocation8 + $0x130] sm:$0xff] %v463_v24 }
 0x1b9   :  { %2236 = vst [vmem:[#allocation8 + $0x138] sm:$0xff] %v576_v63 }
 0x1ba   :  { %v686_v0 = vpop.f32.mrf.mxu0  ;;  %v799_v2 = vpop.f32.mrf.mxu1 }
 0x1bb   :  { %2297 = vst [vmem:[#allocation8 + $0x320] sm:$0xff] %v686_v0 }
 0x1bc   :  { %2298 = vst [vmem:[#allocation8 + $0x328] sm:$0xff] %v799_v2  ;;  %2893 = vmatmul.msk.f32.gmra.mxu2 %vm82_vm0, %v3523_v36  ;;  %2925 = vmatmul.msk.f32.gmra.mxu3 %vm82_vm0, %v3523_v36 }
 0x1bd   :  { %2955 = vmatmul.msk.f32.gmra.mxu0 %vm82_vm0, %v3503_v30  ;;  %2987 = vmatmul.msk.f32.gmra.mxu1 %vm82_vm0, %v3503_v30 }
 0x1bf   :  { %v466_v27 = vpop.f32.mrf.mxu2  ;;  %v579_v3 = vpop.f32.mrf.mxu3 }
 0x1c0   :  { %2237 = vst [vmem:[#allocation8 + $0x140] sm:$0xff] %v466_v27 }
 0x1c1   :  { %2238 = vst [vmem:[#allocation8 + $0x148] sm:$0xff] %v579_v3 }
 0x1c2   :  { %v689_v32 = vpop.f32.mrf.mxu0  ;;  %v802_v35 = vpop.f32.mrf.mxu1 }
 0x1c3   :  { %2299 = vst [vmem:[#allocation8 + $0x330] sm:$0xff] %v689_v32 }
 0x1c4   :  { %2300 = vst [vmem:[#allocation8 + $0x338] sm:$0xff] %v802_v35  ;;  %2894 = vmatmul.msk.f32.gmra.mxu2 %vm82_vm0, %v3533_v39  ;;  %2926 = vmatmul.msk.f32.gmra.mxu3 %vm82_vm0, %v3533_v39 }
 0x1c5   :  { %2956 = vmatmul.msk.f32.gmra.mxu0 %vm82_vm0, %v3513_v33  ;;  %2988 = vmatmul.msk.f32.gmra.mxu1 %vm82_vm0, %v3513_v33 }
 0x1c7   :  { %v469_v30 = vpop.f32.mrf.mxu2  ;;  %v582_v38 = vpop.f32.mrf.mxu3 }
 0x1c8   :  { %2239 = vst [vmem:[#allocation8 + $0x150] sm:$0xff] %v469_v30 }
 0x1c9   :  { %2240 = vst [vmem:[#allocation8 + $0x158] sm:$0xff] %v582_v38 }
 0x1ca   :  { %v692_v40 = vpop.f32.mrf.mxu0  ;;  %v805_v42 = vpop.f32.mrf.mxu1 }
 0x1cb   :  { %2301 = vst [vmem:[#allocation8 + $0x340] sm:$0xff] %v692_v40 }
 0x1cc   :  { %2302 = vst [vmem:[#allocation8 + $0x348] sm:$0xff] %v805_v42  ;;  %2895 = vmatmul.msk.f32.gmra.mxu2 %vm82_vm0, %v3543_v44  ;;  %2927 = vmatmul.msk.f32.gmra.mxu3 %vm82_vm0, %v3543_v44 }
 0x1cd   :  { %2957 = vmatmul.msk.f32.gmra.mxu0 %vm82_vm0, %v3523_v36  ;;  %2989 = vmatmul.msk.f32.gmra.mxu1 %vm82_vm0, %v3523_v36 }
 0x1cf   :  { %v472_v33 = vpop.f32.mrf.mxu2  ;;  %v585_v43 = vpop.f32.mrf.mxu3 }
 0x1d0   :  { %2241 = vst [vmem:[#allocation8 + $0x160] sm:$0xff] %v472_v33 }
 0x1d1   :  { %2242 = vst [vmem:[#allocation8 + $0x168] sm:$0xff] %v585_v43 }
 0x1d2   :  { %v695_v46 = vpop.f32.mrf.mxu0  ;;  %v808_v49 = vpop.f32.mrf.mxu1 }
 0x1d3   :  { %2303 = vst [vmem:[#allocation8 + $0x350] sm:$0xff] %v695_v46 }
 0x1d4   :  { %2304 = vst [vmem:[#allocation8 + $0x358] sm:$0xff] %v808_v49  ;;  %2896 = vmatmul.msk.f32.gmra.mxu2 %vm82_vm0, %v3553_v47  ;;  %2928 = vmatmul.msk.f32.gmra.mxu3 %vm82_vm0, %v3553_v47 }
 0x1d5   :  { %2958 = vmatmul.msk.f32.gmra.mxu0 %vm82_vm0, %v3533_v39  ;;  %2990 = vmatmul.msk.f32.gmra.mxu1 %vm82_vm0, %v3533_v39 }
 0x1d7   :  { %v475_v36 = vpop.f32.mrf.mxu2  ;;  %v588_v51 = vpop.f32.mrf.mxu3 }
 0x1d8   :  { %2243 = vst [vmem:[#allocation8 + $0x170] sm:$0xff] %v475_v36 }
 0x1d9   :  { %2244 = vst [vmem:[#allocation8 + $0x178] sm:$0xff] %v588_v51 }
 0x1da   :  { %v698_v52 = vpop.f32.mrf.mxu0  ;;  %v811_v8 = vpop.f32.mrf.mxu1 }
 0x1db   :  { %2305 = vst [vmem:[#allocation8 + $0x360] sm:$0xff] %v698_v52 }
 0x1dc   :  { %2306 = vst [vmem:[#allocation8 + $0x368] sm:$0xff] %v811_v8  ;;  %2897 = vmatmul.msk.f32.gmra.mxu2 %vm82_vm0, %v3563_v50  ;;  %2929 = vmatmul.msk.f32.gmra.mxu3 %vm82_vm0, %v3563_v50 }
 0x1dd   :  { %2959 = vmatmul.msk.f32.gmra.mxu0 %vm82_vm0, %v3543_v44  ;;  %2991 = vmatmul.msk.f32.gmra.mxu1 %vm82_vm0, %v3543_v44 }
 0x1df   :  { %v478_v39 = vpop.f32.mrf.mxu2  ;;  %v591_v9 = vpop.f32.mrf.mxu3 }
 0x1e0   :  { %2245 = vst [vmem:[#allocation8 + $0x180] sm:$0xff] %v478_v39 }
 0x1e1   :  { %2246 = vst [vmem:[#allocation8 + $0x188] sm:$0xff] %v591_v9 }
 0x1e2   :  { %v701_v11 = vpop.f32.mrf.mxu0  ;;  %v814_v12 = vpop.f32.mrf.mxu1 }
 0x1e3   :  { %2307 = vst [vmem:[#allocation8 + $0x370] sm:$0xff] %v701_v11 }
 0x1e4   :  { %2308 = vst [vmem:[#allocation8 + $0x378] sm:$0xff] %v814_v12  ;;  %2898 = vmatmul.msk.f32.gmra.mxu2 %vm82_vm0, %v3573_v53  ;;  %2930 = vmatmul.msk.f32.gmra.mxu3 %vm82_vm0, %v3573_v53 }
 0x1e5   :  { %2960 = vmatmul.msk.f32.gmra.mxu0 %vm82_vm0, %v3553_v47  ;;  %2992 = vmatmul.msk.f32.gmra.mxu1 %vm82_vm0, %v3553_v47 }
 0x1e7   :  { %v481_v44 = vpop.f32.mrf.mxu2  ;;  %v594_v14 = vpop.f32.mrf.mxu3 }
 0x1e8   :  { %2247 = vst [vmem:[#allocation8 + $0x190] sm:$0xff] %v481_v44 }
 0x1e9   :  { %2248 = vst [vmem:[#allocation8 + $0x198] sm:$0xff] %v594_v14 }
 0x1ea   :  { %v704_v16 = vpop.f32.mrf.mxu0  ;;  %v817_v17 = vpop.f32.mrf.mxu1 }
 0x1eb   :  { %2309 = vst [vmem:[#allocation8 + $0x380] sm:$0xff] %v704_v16 }
 0x1ec   :  { %2310 = vst [vmem:[#allocation8 + $0x388] sm:$0xff] %v817_v17  ;;  %2899 = vmatmul.msk.f32.gmra.mxu2 %vm82_vm0, %v3583_v54  ;;  %2931 = vmatmul.msk.f32.gmra.mxu3 %vm82_vm0, %v3583_v54 }
 0x1ed   :  { %2961 = vmatmul.msk.f32.gmra.mxu0 %vm82_vm0, %v3563_v50  ;;  %2993 = vmatmul.msk.f32.gmra.mxu1 %vm82_vm0, %v3563_v50 }
 0x1ef   :  { %v484_v47 = vpop.f32.mrf.mxu2  ;;  %v597_v18 = vpop.f32.mrf.mxu3 }
 0x1f0   :  { %2249 = vst [vmem:[#allocation8 + $0x1a0] sm:$0xff] %v484_v47 }
 0x1f1   :  { %2250 = vst [vmem:[#allocation8 + $0x1a8] sm:$0xff] %v597_v18 }
 0x1f2   :  { %v707_v21 = vpop.f32.mrf.mxu0  ;;  %v820_v22 = vpop.f32.mrf.mxu1 }
 0x1f3   :  { %2311 = vst [vmem:[#allocation8 + $0x390] sm:$0xff] %v707_v21 }
 0x1f4   :  { %2312 = vst [vmem:[#allocation8 + $0x398] sm:$0xff] %v820_v22  ;;  %2900 = vmatmul.msk.f32.gmra.mxu2 %vm82_vm0, %v3593_v55  ;;  %2932 = vmatmul.msk.f32.gmra.mxu3 %vm82_vm0, %v3593_v55 }
 0x1f5   :  { %2962 = vmatmul.msk.f32.gmra.mxu0 %vm82_vm0, %v3573_v53  ;;  %2994 = vmatmul.msk.f32.gmra.mxu1 %vm82_vm0, %v3573_v53 }
 0x1f7   :  { %v487_v50 = vpop.f32.mrf.mxu2  ;;  %v600_v56 = vpop.f32.mrf.mxu3 }
 0x1f8   :  { %2251 = vst [vmem:[#allocation8 + $0x1b0] sm:$0xff] %v487_v50 }
 0x1f9   :  { %2252 = vst [vmem:[#allocation8 + $0x1b8] sm:$0xff] %v600_v56 }
 0x1fa   :  { %v710_v57 = vpop.f32.mrf.mxu0  ;;  %v823_v60 = vpop.f32.mrf.mxu1 }
 0x1fb   :  { %2313 = vst [vmem:[#allocation8 + $0x3a0] sm:$0xff] %v710_v57 }
 0x1fc   :  { %2314 = vst [vmem:[#allocation8 + $0x3a8] sm:$0xff] %v823_v60  ;;  %2901 = vmatmul.msk.f32.gmra.mxu2 %vm82_vm0, %v3607_v58  ;;  %2933 = vmatmul.msk.f32.gmra.mxu3 %vm82_vm0, %v3607_v58 }
 0x1fd   :  { %2963 = vmatmul.msk.f32.gmra.mxu0 %vm82_vm0, %v3583_v54  ;;  %2995 = vmatmul.msk.f32.gmra.mxu1 %vm82_vm0, %v3583_v54 }
 0x1ff   :  { %v490_v53 = vpop.f32.mrf.mxu2  ;;  %v603_v61 = vpop.f32.mrf.mxu3 }
 0x200   :  { %2253 = vst [vmem:[#allocation8 + $0x1c0] sm:$0xff] %v490_v53 }
 0x201   :  { %2254 = vst [vmem:[#allocation8 + $0x1c8] sm:$0xff] %v603_v61 }
 0x202   :  { %v713_v23 = vpop.f32.mrf.mxu0  ;;  %v826_v25 = vpop.f32.mrf.mxu1 }
 0x203   :  { %2315 = vst [vmem:[#allocation8 + $0x3b0] sm:$0xff] %v713_v23 }
 0x204   :  { %2316 = vst [vmem:[#allocation8 + $0x3b8] sm:$0xff] %v826_v25  ;;  %2902 = vmatmul.msk.f32.gmra.mxu2 %vm82_vm0, %v3617_v59  ;;  %2934 = vmatmul.msk.f32.gmra.mxu3 %vm82_vm0, %v3617_v59 }
 0x205   :  { %2964 = vmatmul.msk.f32.gmra.mxu0 %vm82_vm0, %v3593_v55  ;;  %2996 = vmatmul.msk.f32.gmra.mxu1 %vm82_vm0, %v3593_v55 }
 0x207   :  { %v493_v54 = vpop.f32.mrf.mxu2  ;;  %v606_v29 = vpop.f32.mrf.mxu3 }
 0x208   :  { %2255 = vst [vmem:[#allocation8 + $0x1d0] sm:$0xff] %v493_v54 }
 0x209   :  { %2256 = vst [vmem:[#allocation8 + $0x1d8] sm:$0xff] %v606_v29 }
 0x20a   :  { %v716_v31 = vpop.f32.mrf.mxu0  ;;  %v829_v24 = vpop.f32.mrf.mxu1 }
 0x20b   :  { %2317 = vst [vmem:[#allocation8 + $0x3c0] sm:$0xff] %v716_v31 }
 0x20c   :  { %2318 = vst [vmem:[#allocation8 + $0x3c8] sm:$0xff] %v829_v24  ;;  %2903 = vmatmul.msk.f32.gmra.mxu2 %vm82_vm0, %v3631_v62  ;;  %2935 = vmatmul.msk.f32.gmra.mxu3 %vm82_vm0, %v3631_v62 }
 0x20d   :  { %2965 = vmatmul.msk.f32.gmra.mxu0 %vm82_vm0, %v3607_v58  ;;  %2997 = vmatmul.msk.f32.gmra.mxu1 %vm82_vm0, %v3607_v58 }
 0x20f   :  { %v496_v55 = vpop.f32.mrf.mxu2  ;;  %v609_v63 = vpop.f32.mrf.mxu3 }
 0x210   :  { %2257 = vst [vmem:[#allocation8 + $0x1e0] sm:$0xff] %v496_v55 }
 0x211   :  { %2258 = vst [vmem:[#allocation8 + $0x1e8] sm:$0xff] %v609_v63 }
 0x212   :  { %v719_v0 = vpop.f32.mrf.mxu0  ;;  %v832_v2 = vpop.f32.mrf.mxu1 }
 0x213   :  { %2319 = vst [vmem:[#allocation8 + $0x3d0] sm:$0xff] %v719_v0 }
 0x214   :  { %2320 = vst [vmem:[#allocation8 + $0x3d8] sm:$0xff] %v832_v2  ;;  %2904 = vmatmul.msk.f32.gmra.mxu2 %vm82_vm0, %v3645_v1  ;;  %2936 = vmatmul.msk.f32.gmra.mxu3 %vm82_vm0, %v3645_v1 }
 0x215   :  { %2966 = vmatmul.msk.f32.gmra.mxu0 %vm82_vm0, %v3617_v59  ;;  %2998 = vmatmul.msk.f32.gmra.mxu1 %vm82_vm0, %v3617_v59 }
 0x217   :  { %v499_v58 = vpop.f32.mrf.mxu2  ;;  %v612_v27 = vpop.f32.mrf.mxu3 }
 0x218   :  { %2259 = vst [vmem:[#allocation8 + $0x1f0] sm:$0xff] %v499_v58 }
 0x219   :  { %2260 = vst [vmem:[#allocation8 + $0x1f8] sm:$0xff] %v612_v27 }
 0x21a   :  { %v722_v3 = vpop.f32.mrf.mxu0  ;;  %v835_v32 = vpop.f32.mrf.mxu1 }
 0x21b   :  { %2321 = vst [vmem:[#allocation8 + $0x3e0] sm:$0xff] %v722_v3 }
 0x21c   :  { %2322 = vst [vmem:[#allocation8 + $0x3e8] sm:$0xff] %v835_v32  ;;  %2905 = vmatmul.msk.f32.gmra.mxu2 %vm82_vm0, %v3659_v4  ;;  %2937 = vmatmul.msk.f32.gmra.mxu3 %vm82_vm0, %v3659_v4 }
 0x21d   :  { %2967 = vmatmul.msk.f32.gmra.mxu0 %vm82_vm0, %v3631_v62  ;;  %2999 = vmatmul.msk.f32.gmra.mxu1 %vm82_vm0, %v3631_v62 }
 0x21f   :  { %v858_v59 = vpop.f32.mrf.mxu2  ;;  %v971_v35 = vpop.f32.mrf.mxu3 }
 0x220   :  { %2325 = vst [vmem:[#allocation8 + $0x400] sm:$0xff] %v858_v59 }
 0x221   :  { %2326 = vst [vmem:[#allocation8 + $0x408] sm:$0xff] %v971_v35 }
 0x222   :  { %v725_v30 = vpop.f32.mrf.mxu0  ;;  %v838_v38 = vpop.f32.mrf.mxu1 }
 0x223   :  { %2323 = vst [vmem:[#allocation8 + $0x3f0] sm:$0xff] %v725_v30 }
 0x224   :  { %2324 = vst [vmem:[#allocation8 + $0x3f8] sm:$0xff] %v838_v38  ;;  %2906 = vmatmul.msk.f32.gmra.mxu2 %vm82_vm0, %v3669_v7  ;;  %2938 = vmatmul.msk.f32.gmra.mxu3 %vm82_vm0, %v3669_v7  ;;  %v4083_v38 = vld [vmem:[#allocation2] sm:$0xff] }
 0x225   :  { %2968 = vmatmul.msk.f32.gmra.mxu0 %vm82_vm0, %v3645_v1  ;;  %3000 = vmatmul.msk.f32.gmra.mxu1 %vm82_vm0, %v3645_v1 }
 0x227   :  { %v861_v62 = vpop.f32.mrf.mxu2  ;;  %v974_v40 = vpop.f32.mrf.mxu3 }
 0x228   :  { %2327 = vst [vmem:[#allocation8 + $0x410] sm:$0xff] %v861_v62 }
 0x229   :  { %2328 = vst [vmem:[#allocation8 + $0x418] sm:$0xff] %v974_v40 }
 0x22a   :  { %v1084_v42 = vpop.f32.mrf.mxu0  ;;  %v1197_v33 = vpop.f32.mrf.mxu1 }
 0x22b   :  { %2389 = vst [vmem:[#allocation8 + $0x600] sm:$0xff] %v1084_v42 }
 0x22c   :  { %2390 = vst [vmem:[#allocation8 + $0x608] sm:$0xff] %v1197_v33  ;;  %2907 = vmatmul.msk.f32.gmra.mxu2 %vm82_vm0, %v3679_v10  ;;  %2939 = vmatmul.msk.f32.gmra.mxu3 %vm82_vm0, %v3679_v10  ;;  %v4093_v33 = vld [vmem:[#allocation2 + $0x8] sm:$0xff] }
 0x22d   :  { %2969 = vmatmul.msk.f32.gmra.mxu0 %vm82_vm0, %v3659_v4  ;;  %3001 = vmatmul.msk.f32.gmra.mxu1 %vm82_vm0, %v3659_v4 }
 0x22f   :  { %v864_v1 = vpop.f32.mrf.mxu2  ;;  %v977_v43 = vpop.f32.mrf.mxu3 }
 0x230   :  { %2329 = vst [vmem:[#allocation8 + $0x420] sm:$0xff] %v864_v1 }
 0x231   :  { %2330 = vst [vmem:[#allocation8 + $0x428] sm:$0xff] %v977_v43 }
 0x232   :  { %v1087_v46 = vpop.f32.mrf.mxu0  ;;  %v1200_v49 = vpop.f32.mrf.mxu1 }
 0x233   :  { %2391 = vst [vmem:[#allocation8 + $0x610] sm:$0xff] %v1087_v46 }
 0x234   :  { %2392 = vst [vmem:[#allocation8 + $0x618] sm:$0xff] %v1200_v49  ;;  %2908 = vmatmul.msk.f32.gmra.mxu2 %vm82_vm0, %v3689_v15  ;;  %2940 = vmatmul.msk.f32.gmra.mxu3 %vm82_vm0, %v3689_v15  ;;  %v4103_v49 = vld [vmem:[#allocation2 + $0x10] sm:$0xff] }
 0x235   :  { %2970 = vmatmul.msk.f32.gmra.mxu0 %vm82_vm0, %v3669_v7  ;;  %3002 = vmatmul.msk.f32.gmra.mxu1 %vm82_vm0, %v3669_v7 }
 0x237   :  { %v867_v4 = vpop.f32.mrf.mxu2  ;;  %v980_v36 = vpop.f32.mrf.mxu3 }
 0x238   :  { %2331 = vst [vmem:[#allocation8 + $0x430] sm:$0xff] %v867_v4 }
 0x239   :  { %2332 = vst [vmem:[#allocation8 + $0x438] sm:$0xff] %v980_v36 }
 0x23a   :  { %v1090_v51 = vpop.f32.mrf.mxu0  ;;  %v1203_v52 = vpop.f32.mrf.mxu1 }
 0x23b   :  { %2393 = vst [vmem:[#allocation8 + $0x620] sm:$0xff] %v1090_v51 }
 0x23c   :  { %2394 = vst [vmem:[#allocation8 + $0x628] sm:$0xff] %v1203_v52  ;;  %2909 = vmatmul.msk.f32.gmra.mxu2 %vm82_vm0, %v3699_v20  ;;  %2941 = vmatmul.msk.f32.gmra.mxu3 %vm82_vm0, %v3699_v20  ;;  %v4113_v52 = vld [vmem:[#allocation2 + $0x18] sm:$0xff] }
 0x23d   :  { %2971 = vmatmul.msk.f32.gmra.mxu0 %vm82_vm0, %v3679_v10  ;;  %3003 = vmatmul.msk.f32.gmra.mxu1 %vm82_vm0, %v3679_v10 }
 0x23f   :  { %v870_v7 = vpop.f32.mrf.mxu2  ;;  %v983_v8 = vpop.f32.mrf.mxu3 }
 0x240   :  { %2333 = vst [vmem:[#allocation8 + $0x440] sm:$0xff] %v870_v7 }
 0x241   :  { %2334 = vst [vmem:[#allocation8 + $0x448] sm:$0xff] %v983_v8 }
 0x242   :  { %v1093_v39 = vpop.f32.mrf.mxu0  ;;  %v1206_v9 = vpop.f32.mrf.mxu1 }
 0x243   :  { %2395 = vst [vmem:[#allocation8 + $0x630] sm:$0xff] %v1093_v39 }
 0x244   :  { %2396 = vst [vmem:[#allocation8 + $0x638] sm:$0xff] %v1206_v9  ;;  %2910 = vmatmul.msk.f32.gmra.mxu2 %vm82_vm0, %v3709_v26  ;;  %2942 = vmatmul.msk.f32.gmra.mxu3 %vm82_vm0, %v3709_v26 }
 0x245   :  { %2972 = vmatmul.msk.f32.gmra.mxu0 %vm82_vm0, %v3689_v15  ;;  %3004 = vmatmul.msk.f32.gmra.mxu1 %vm82_vm0, %v3689_v15 }
 0x247   :  { %v873_v10 = vpop.f32.mrf.mxu2  ;;  %v986_v11 = vpop.f32.mrf.mxu3 }
 0x248   :  { %2335 = vst [vmem:[#allocation8 + $0x450] sm:$0xff] %v873_v10  ;;  %v4123_v10 = vld [vmem:[#allocation2 + $0x20] sm:$0xff] }
 0x249   :  { %2336 = vst [vmem:[#allocation8 + $0x458] sm:$0xff] %v986_v11 }
 0x24a   :  { %v1096_v12 = vpop.f32.mrf.mxu0  ;;  %v1209_v44 = vpop.f32.mrf.mxu1 }
 0x24b   :  { %2397 = vst [vmem:[#allocation8 + $0x640] sm:$0xff] %v1096_v12 }
 0x24c   :  { %2398 = vst [vmem:[#allocation8 + $0x648] sm:$0xff] %v1209_v44  ;;  %2911 = vmatmul.msk.f32.gmra.mxu2 %vm82_vm0, %v3719_v34  ;;  %2943 = vmatmul.msk.f32.gmra.mxu3 %vm82_vm0, %v3719_v34 }
 0x24d   :  { %2973 = vmatmul.msk.f32.gmra.mxu0 %vm82_vm0, %v3699_v20  ;;  %3005 = vmatmul.msk.f32.gmra.mxu1 %vm82_vm0, %v3699_v20 }
 0x24f   :  { %v876_v15 = vpop.f32.mrf.mxu2  ;;  %v989_v14 = vpop.f32.mrf.mxu3 }
 0x250   :  { %2337 = vst [vmem:[#allocation8 + $0x460] sm:$0xff] %v876_v15 }
 0x251   :  { %2338 = vst [vmem:[#allocation8 + $0x468] sm:$0xff] %v989_v14  ;;  %v4133_v14 = vld [vmem:[#allocation2 + $0x28] sm:$0xff] }
 0x252   :  { %v1099_v16 = vpop.f32.mrf.mxu0  ;;  %v1212_v17 = vpop.f32.mrf.mxu1 }
 0x253   :  { %2399 = vst [vmem:[#allocation8 + $0x650] sm:$0xff] %v1099_v16 }
 0x254   :  { %2400 = vst [vmem:[#allocation8 + $0x658] sm:$0xff] %v1212_v17  ;;  %2912 = vmatmul.msk.f32.gmra.mxu2 %vm82_vm0, %v3729_v41  ;;  %2944 = vmatmul.msk.f32.gmra.mxu3 %vm82_vm0, %v3729_v41 }
 0x255   :  { %2974 = vmatmul.msk.f32.gmra.mxu0 %vm82_vm0, %v3709_v26  ;;  %3006 = vmatmul.msk.f32.gmra.mxu1 %vm82_vm0, %v3709_v26 }
 0x257   :  { %v879_v20 = vpop.f32.mrf.mxu2  ;;  %v992_v47 = vpop.f32.mrf.mxu3 }
 0x258   :  { %2339 = vst [vmem:[#allocation8 + $0x470] sm:$0xff] %v879_v20 }
 0x259   :  { %2340 = vst [vmem:[#allocation8 + $0x478] sm:$0xff] %v992_v47 }
 0x25a   :  { %v1102_v18 = vpop.f32.mrf.mxu0  ;;  %v1215_v21 = vpop.f32.mrf.mxu1 }
 0x25b   :  { %2401 = vst [vmem:[#allocation8 + $0x660] sm:$0xff] %v1102_v18  ;;  %v4143_v18 = vld [vmem:[#allocation2 + $0x30] sm:$0xff] }
 0x25c   :  { %2402 = vst [vmem:[#allocation8 + $0x668] sm:$0xff] %v1215_v21  ;;  %2913 = vmatmul.msk.f32.gmra.mxu2 %vm82_vm0, %v3739_v48  ;;  %2945 = vmatmul.msk.f32.gmra.mxu3 %vm82_vm0, %v3739_v48 }
 0x25d   :  { %2975 = vmatmul.msk.f32.gmra.mxu0 %vm82_vm0, %v3719_v34  ;;  %3007 = vmatmul.msk.f32.gmra.mxu1 %vm82_vm0, %v3719_v34 }
 0x25f   :  { %v882_v26 = vpop.f32.mrf.mxu2  ;;  %v995_v22 = vpop.f32.mrf.mxu3 }
 0x260   :  { %2341 = vst [vmem:[#allocation8 + $0x480] sm:$0xff] %v882_v26 }
 0x261   :  { %2342 = vst [vmem:[#allocation8 + $0x488] sm:$0xff] %v995_v22 }
 0x262   :  { %v1105_v50 = vpop.f32.mrf.mxu0  ;;  %v1218_v56 = vpop.f32.mrf.mxu1 }
 0x263   :  { %2403 = vst [vmem:[#allocation8 + $0x670] sm:$0xff] %v1105_v50 }
 0x264   :  { %2404 = vst [vmem:[#allocation8 + $0x678] sm:$0xff] %v1218_v56  ;;  %2914 = vmatmul.msk.f32.gmra.mxu2 %vm82_vm0, %v3749_v6  ;;  %2946 = vmatmul.msk.f32.gmra.mxu3 %vm82_vm0, %v3749_v6  ;;  %v4153_v56 = vld [vmem:[#allocation2 + $0x38] sm:$0xff] }
 0x265   :  { %2976 = vmatmul.msk.f32.gmra.mxu0 %vm82_vm0, %v3729_v41  ;;  %3008 = vmatmul.msk.f32.gmra.mxu1 %vm82_vm0, %v3729_v41 }
 0x267   :  { %v885_v34 = vpop.f32.mrf.mxu2  ;;  %v998_v57 = vpop.f32.mrf.mxu3 }
 0x268   :  { %2343 = vst [vmem:[#allocation8 + $0x490] sm:$0xff] %v885_v34 }
 0x269   :  { %2344 = vst [vmem:[#allocation8 + $0x498] sm:$0xff] %v998_v57 }
 0x26a   :  { %v1108_v60 = vpop.f32.mrf.mxu0  ;;  %v1221_v53 = vpop.f32.mrf.mxu1 }
 0x26b   :  { %2405 = vst [vmem:[#allocation8 + $0x680] sm:$0xff] %v1108_v60 }
 0x26c   :  { %2406 = vst [vmem:[#allocation8 + $0x688] sm:$0xff] %v1221_v53  ;;  %2915 = vmatmul.msk.f32.gmra.mxu2 %vm82_vm0, %v3759_v13  ;;  %2947 = vmatmul.msk.f32.gmra.mxu3 %vm82_vm0, %v3759_v13 }
 0x26d   :  { %2977 = vmatmul.msk.f32.gmra.mxu0 %vm82_vm0, %v3739_v48  ;;  %3009 = vmatmul.msk.f32.gmra.mxu1 %vm82_vm0, %v3739_v48 }
 0x26f   :  { %v888_v41 = vpop.f32.mrf.mxu2  ;;  %v1001_v61 = vpop.f32.mrf.mxu3 }
 0x270   :  { %2345 = vst [vmem:[#allocation8 + $0x4a0] sm:$0xff] %v888_v41  ;;  %v4163_v41 = vld [vmem:[#allocation2 + $0x40] sm:$0xff] }
 0x271   :  { %2346 = vst [vmem:[#allocation8 + $0x4a8] sm:$0xff] %v1001_v61 }
 0x272   :  { %v1111_v23 = vpop.f32.mrf.mxu0  ;;  %v1224_v25 = vpop.f32.mrf.mxu1 }
 0x273   :  { %2407 = vst [vmem:[#allocation8 + $0x690] sm:$0xff] %v1111_v23 }
 0x274   :  { %2408 = vst [vmem:[#allocation8 + $0x698] sm:$0xff] %v1224_v25  ;;  %2916 = vmatmul.msk.f32.gmra.mxu2 %vm82_vm0, %v3769_v19  ;;  %2948 = vmatmul.msk.f32.gmra.mxu3 %vm82_vm0, %v3769_v19 }
 0x275   :  { %2978 = vmatmul.msk.f32.gmra.mxu0 %vm82_vm0, %v3749_v6  ;;  %3010 = vmatmul.msk.f32.gmra.mxu1 %vm82_vm0, %v3749_v6 }
 0x277   :  { %v891_v48 = vpop.f32.mrf.mxu2  ;;  %v1004_v54 = vpop.f32.mrf.mxu3 }
 0x278   :  { %2347 = vst [vmem:[#allocation8 + $0x4b0] sm:$0xff] %v891_v48 }
 0x279   :  { %2348 = vst [vmem:[#allocation8 + $0x4b8] sm:$0xff] %v1004_v54  ;;  %v4173_v54 = vld [vmem:[#allocation2 + $0x48] sm:$0xff] }
 0x27a   :  { %v1114_v29 = vpop.f32.mrf.mxu0  ;;  %v1227_v31 = vpop.f32.mrf.mxu1 }
 0x27b   :  { %2409 = vst [vmem:[#allocation8 + $0x6a0] sm:$0xff] %v1114_v29 }
 0x27c   :  { %2410 = vst [vmem:[#allocation8 + $0x6a8] sm:$0xff] %v1227_v31  ;;  %2917 = vmatmul.msk.f32.gmra.mxu2 %vm82_vm0, %v3779_v28  ;;  %2949 = vmatmul.msk.f32.gmra.mxu3 %vm82_vm0, %v3779_v28 }
 0x27d   :  { %2979 = vmatmul.msk.f32.gmra.mxu0 %vm82_vm0, %v3759_v13  ;;  %3011 = vmatmul.msk.f32.gmra.mxu1 %vm82_vm0, %v3759_v13 }
 0x27f   :  { %v894_v6 = vpop.f32.mrf.mxu2  ;;  %v1007_v24 = vpop.f32.mrf.mxu3 }
 0x280   :  { %2349 = vst [vmem:[#allocation8 + $0x4c0] sm:$0xff] %v894_v6 }
 0x281   :  { %2350 = vst [vmem:[#allocation8 + $0x4c8] sm:$0xff] %v1007_v24 }
 0x282   :  { %v1117_v55 = vpop.f32.mrf.mxu0  ;;  %v1230_v63 = vpop.f32.mrf.mxu1 }
 0x283   :  { %2411 = vst [vmem:[#allocation8 + $0x6b0] sm:$0xff] %v1117_v55  ;;  %v4183_v55 = vld [vmem:[#allocation2 + $0x50] sm:$0xff] }
 0x284   :  { %2412 = vst [vmem:[#allocation8 + $0x6b8] sm:$0xff] %v1230_v63  ;;  %2918 = vmatmul.msk.f32.gmra.mxu2 %vm82_vm0, %v3789_v37  ;;  %2950 = vmatmul.msk.f32.gmra.mxu3 %vm82_vm0, %v3789_v37 }
 0x285   :  { %2980 = vmatmul.msk.f32.gmra.mxu0 %vm82_vm0, %v3769_v19  ;;  %3012 = vmatmul.msk.f32.gmra.mxu1 %vm82_vm0, %v3769_v19 }
 0x287   :  { %v897_v13 = vpop.f32.mrf.mxu2  ;;  %v1010_v0 = vpop.f32.mrf.mxu3 }
 0x288   :  { %2351 = vst [vmem:[#allocation8 + $0x4d0] sm:$0xff] %v897_v13 }
 0x289   :  { %2352 = vst [vmem:[#allocation8 + $0x4d8] sm:$0xff] %v1010_v0 }
 0x28a   :  { %v1120_v2 = vpop.f32.mrf.mxu0  ;;  %v1233_v58 = vpop.f32.mrf.mxu1 }
 0x28b   :  { %2413 = vst [vmem:[#allocation8 + $0x6c0] sm:$0xff] %v1120_v2 }
 0x28c   :  { %2414 = vst [vmem:[#allocation8 + $0x6c8] sm:$0xff] %v1233_v58  ;;  %2919 = vmatmul.msk.f32.gmra.mxu2 %vm82_vm0, %v3799_v45  ;;  %2951 = vmatmul.msk.f32.gmra.mxu3 %vm82_vm0, %v3799_v45  ;;  %v4193_v58 = vld [vmem:[#allocation2 + $0x58] sm:$0xff] }
 0x28d   :  { %2981 = vmatmul.msk.f32.gmra.mxu0 %vm82_vm0, %v3779_v28  ;;  %3013 = vmatmul.msk.f32.gmra.mxu1 %vm82_vm0, %v3779_v28 }
 0x28f   :  { %v900_v19 = vpop.f32.mrf.mxu2  ;;  %v1013_v27 = vpop.f32.mrf.mxu3 }
 0x290   :  { %2353 = vst [vmem:[#allocation8 + $0x4e0] sm:$0xff] %v900_v19 }
 0x291   :  { %2354 = vst [vmem:[#allocation8 + $0x4e8] sm:$0xff] %v1013_v27 }
 0x292   :  { %v1123_v3 = vpop.f32.mrf.mxu0  ;;  %v1236_v32 = vpop.f32.mrf.mxu1 }
 0x293   :  { %2415 = vst [vmem:[#allocation8 + $0x6d0] sm:$0xff] %v1123_v3 }
 0x294   :  { %2416 = vst [vmem:[#allocation8 + $0x6d8] sm:$0xff] %v1236_v32  ;;  %2920 = vmatmul.msk.f32.gmra.mxu2 %vm82_vm0, %v3809_v5  ;;  %2952 = vmatmul.msk.f32.gmra.mxu3 %vm82_vm0, %v3809_v5 }
 0x295   :  { %2982 = vmatmul.msk.f32.gmra.mxu0 %vm82_vm0, %v3789_v37  ;;  %3014 = vmatmul.msk.f32.gmra.mxu1 %vm82_vm0, %v3789_v37 }
 0x297   :  { %v903_v28 = vpop.f32.mrf.mxu2  ;;  %v1016_v59 = vpop.f32.mrf.mxu3 }
 0x298   :  { %2355 = vst [vmem:[#allocation8 + $0x4f0] sm:$0xff] %v903_v28  ;;  %v4203_v28 = vld [vmem:[#allocation2 + $0x60] sm:$0xff] }
 0x299   :  { %2356 = vst [vmem:[#allocation8 + $0x4f8] sm:$0xff] %v1016_v59 }
 0x29a   :  { %v1126_v35 = vpop.f32.mrf.mxu0  ;;  %v1239_v30 = vpop.f32.mrf.mxu1 }
 0x29b   :  { %2417 = vst [vmem:[#allocation8 + $0x6e0] sm:$0xff] %v1126_v35 }
 0x29c   :  { %2418 = vst [vmem:[#allocation8 + $0x6e8] sm:$0xff] %v1239_v30  ;;  %3017 = vmatmul.msk.f32.vlgmr.msrb.gmra.mxu2 %vm82_vm0, %v4083_v38  ;;  %3049 = vmatmul.msk.f32.vlgmr.msrb.gmra.mxu3 %vm82_vm0, %v4083_v38 }
 0x29d   :  { %2983 = vmatmul.msk.f32.gmra.mxu0 %vm82_vm0, %v3799_v45  ;;  %3015 = vmatmul.msk.f32.gmra.mxu1 %vm82_vm0, %v3799_v45 }
 0x29f   :  { %v906_v37 = vpop.f32.mrf.mxu2  ;;  %v1019_v62 = vpop.f32.mrf.mxu3 }
 0x2a0   :  { %2357 = vst [vmem:[#allocation8 + $0x500] sm:$0xff] %v906_v37 }
 0x2a1   :  { %2358 = vst [vmem:[#allocation8 + $0x508] sm:$0xff] %v1019_v62  ;;  %v4213_v62 = vld [vmem:[#allocation2 + $0x68] sm:$0xff] }
 0x2a2   :  { %v1129_v40 = vpop.f32.mrf.mxu0  ;;  %v1242_v42 = vpop.f32.mrf.mxu1 }
 0x2a3   :  { %2419 = vst [vmem:[#allocation8 + $0x6f0] sm:$0xff] %v1129_v40 }
 0x2a4   :  { %2420 = vst [vmem:[#allocation8 + $0x6f8] sm:$0xff] %v1242_v42  ;;  %3018 = vmatmul.msk.f32.gmra.mxu2 %vm82_vm0, %v4093_v33  ;;  %3050 = vmatmul.msk.f32.gmra.mxu3 %vm82_vm0, %v4093_v33 }
 0x2a5   :  { %2984 = vmatmul.msk.f32.gmra.mxu0 %vm82_vm0, %v3809_v5  ;;  %3016 = vmatmul.msk.f32.gmra.mxu1 %vm82_vm0, %v3809_v5 }
 0x2a7   :  { %v909_v45 = vpop.f32.mrf.mxu2  ;;  %v1022_v1 = vpop.f32.mrf.mxu3 }
 0x2a8   :  { %2359 = vst [vmem:[#allocation8 + $0x510] sm:$0xff] %v909_v45 }
 0x2a9   :  { %2360 = vst [vmem:[#allocation8 + $0x518] sm:$0xff] %v1022_v1 }
 0x2aa   :  { %v1132_v43 = vpop.f32.mrf.mxu0  ;;  %v1245_v46 = vpop.f32.mrf.mxu1 }
 0x2ab   :  { %2421 = vst [vmem:[#allocation8 + $0x700] sm:$0xff] %v1132_v43  ;;  %v4223_v43 = vld [vmem:[#allocation2 + $0x70] sm:$0xff] }
 0x2ac   :  { %2422 = vst [vmem:[#allocation8 + $0x708] sm:$0xff] %v1245_v46  ;;  %3019 = vmatmul.msk.f32.gmra.mxu2 %vm82_vm0, %v4103_v49  ;;  %3051 = vmatmul.msk.f32.gmra.mxu3 %vm82_vm0, %v4103_v49 }
 0x2ad   :  { %3081 = vmatmul.msk.f32.vlgmr.msrb.gmra.mxu0 %vm82_vm0, %v4083_v38  ;;  %3113 = vmatmul.msk.f32.vlgmr.msrb.gmra.mxu1 %vm82_vm0, %v4083_v38 }
 0x2af   :  { %v912_v5 = vpop.f32.mrf.mxu2  ;;  %v1025_v4 = vpop.f32.mrf.mxu3 }
 0x2b0   :  { %2361 = vst [vmem:[#allocation8 + $0x520] sm:$0xff] %v912_v5 }
 0x2b1   :  { %2362 = vst [vmem:[#allocation8 + $0x528] sm:$0xff] %v1025_v4 }
 0x2b2   :  { %v1135_v36 = vpop.f32.mrf.mxu0  ;;  %v1248_v51 = vpop.f32.mrf.mxu1 }
 0x2b3   :  { %2423 = vst [vmem:[#allocation8 + $0x710] sm:$0xff] %v1135_v36 }
 0x2b4   :  { %2424 = vst [vmem:[#allocation8 + $0x718] sm:$0xff] %v1248_v51  ;;  %3020 = vmatmul.msk.f32.gmra.mxu2 %vm82_vm0, %v4113_v52  ;;  %3052 = vmatmul.msk.f32.gmra.mxu3 %vm82_vm0, %v4113_v52  ;;  %v4233_v51 = vld [vmem:[#allocation2 + $0x78] sm:$0xff] }
 0x2b5   :  { %3082 = vmatmul.msk.f32.gmra.mxu0 %vm82_vm0, %v4093_v33  ;;  %3114 = vmatmul.msk.f32.gmra.mxu1 %vm82_vm0, %v4093_v33 }
 0x2b7   :  { %v915_v7 = vpop.f32.mrf.mxu2  ;;  %v1028_v8 = vpop.f32.mrf.mxu3 }
 0x2b8   :  { %2363 = vst [vmem:[#allocation8 + $0x530] sm:$0xff] %v915_v7 }
 0x2b9   :  { %2364 = vst [vmem:[#allocation8 + $0x538] sm:$0xff] %v1028_v8 }
 0x2ba   :  { %v1138_v39 = vpop.f32.mrf.mxu0  ;;  %v1251_v9 = vpop.f32.mrf.mxu1 }
 0x2bb   :  { %2425 = vst [vmem:[#allocation8 + $0x720] sm:$0xff] %v1138_v39 }
 0x2bc   :  { %2426 = vst [vmem:[#allocation8 + $0x728] sm:$0xff] %v1251_v9  ;;  %3021 = vmatmul.msk.f32.gmra.mxu2 %vm82_vm0, %v4123_v10  ;;  %3053 = vmatmul.msk.f32.gmra.mxu3 %vm82_vm0, %v4123_v10 }
 0x2bd   :  { %3083 = vmatmul.msk.f32.gmra.mxu0 %vm82_vm0, %v4103_v49  ;;  %3115 = vmatmul.msk.f32.gmra.mxu1 %vm82_vm0, %v4103_v49 }
 0x2bf   :  { %v918_v11 = vpop.f32.mrf.mxu2  ;;  %v1031_v12 = vpop.f32.mrf.mxu3 }
 0x2c0   :  { %2365 = vst [vmem:[#allocation8 + $0x540] sm:$0xff] %v918_v11  ;;  %v4243_v11 = vld [vmem:[#allocation2 + $0x80] sm:$0xff] }
 0x2c1   :  { %2366 = vst [vmem:[#allocation8 + $0x548] sm:$0xff] %v1031_v12 }
 0x2c2   :  { %v1141_v44 = vpop.f32.mrf.mxu0  ;;  %v1254_v15 = vpop.f32.mrf.mxu1 }
 0x2c3   :  { %2427 = vst [vmem:[#allocation8 + $0x730] sm:$0xff] %v1141_v44 }
 0x2c4   :  { %2428 = vst [vmem:[#allocation8 + $0x738] sm:$0xff] %v1254_v15  ;;  %3022 = vmatmul.msk.f32.gmra.mxu2 %vm82_vm0, %v4133_v14  ;;  %3054 = vmatmul.msk.f32.gmra.mxu3 %vm82_vm0, %v4133_v14 }
 0x2c5   :  { %3084 = vmatmul.msk.f32.gmra.mxu0 %vm82_vm0, %v4113_v52  ;;  %3116 = vmatmul.msk.f32.gmra.mxu1 %vm82_vm0, %v4113_v52 }
 0x2c7   :  { %v921_v16 = vpop.f32.mrf.mxu2  ;;  %v1034_v17 = vpop.f32.mrf.mxu3 }
 0x2c8   :  { %2367 = vst [vmem:[#allocation8 + $0x550] sm:$0xff] %v921_v16 }
 0x2c9   :  { %2368 = vst [vmem:[#allocation8 + $0x558] sm:$0xff] %v1034_v17  ;;  %v4253_v17 = vld [vmem:[#allocation2 + $0x88] sm:$0xff] }
 0x2ca   :  { %v1144_v20 = vpop.f32.mrf.mxu0  ;;  %v1257_v47 = vpop.f32.mrf.mxu1 }
 0x2cb   :  { %2429 = vst [vmem:[#allocation8 + $0x740] sm:$0xff] %v1144_v20 }
 0x2cc   :  { %2430 = vst [vmem:[#allocation8 + $0x748] sm:$0xff] %v1257_v47  ;;  %3023 = vmatmul.msk.f32.gmra.mxu2 %vm82_vm0, %v4143_v18  ;;  %3055 = vmatmul.msk.f32.gmra.mxu3 %vm82_vm0, %v4143_v18 }
 0x2cd   :  { %3085 = vmatmul.msk.f32.gmra.mxu0 %vm82_vm0, %v4123_v10  ;;  %3117 = vmatmul.msk.f32.gmra.mxu1 %vm82_vm0, %v4123_v10 }
 0x2cf   :  { %v924_v21 = vpop.f32.mrf.mxu2  ;;  %v1037_v26 = vpop.f32.mrf.mxu3 }
 0x2d0   :  { %2369 = vst [vmem:[#allocation8 + $0x560] sm:$0xff] %v924_v21 }
 0x2d1   :  { %2370 = vst [vmem:[#allocation8 + $0x568] sm:$0xff] %v1037_v26 }
 0x2d2   :  { %v1147_v22 = vpop.f32.mrf.mxu0  ;;  %v1260_v50 = vpop.f32.mrf.mxu1 }
 0x2d3   :  { %2431 = vst [vmem:[#allocation8 + $0x750] sm:$0xff] %v1147_v22  ;;  %v4263_v22 = vld [vmem:[#allocation2 + $0x90] sm:$0xff] }
 0x2d4   :  { %2432 = vst [vmem:[#allocation8 + $0x758] sm:$0xff] %v1260_v50  ;;  %3024 = vmatmul.msk.f32.gmra.mxu2 %vm82_vm0, %v4153_v56  ;;  %3056 = vmatmul.msk.f32.gmra.mxu3 %vm82_vm0, %v4153_v56 }
 0x2d5   :  { %3086 = vmatmul.msk.f32.gmra.mxu0 %vm82_vm0, %v4133_v14  ;;  %3118 = vmatmul.msk.f32.gmra.mxu1 %vm82_vm0, %v4133_v14 }
 0x2d7   :  { %v927_v34 = vpop.f32.mrf.mxu2  ;;  %v1040_v57 = vpop.f32.mrf.mxu3 }
 0x2d8   :  { %2371 = vst [vmem:[#allocation8 + $0x570] sm:$0xff] %v927_v34 }
 0x2d9   :  { %2372 = vst [vmem:[#allocation8 + $0x578] sm:$0xff] %v1040_v57 }
 0x2da   :  { %v1150_v60 = vpop.f32.mrf.mxu0  ;;  %v1263_v53 = vpop.f32.mrf.mxu1 }
 0x2db   :  { %2433 = vst [vmem:[#allocation8 + $0x760] sm:$0xff] %v1150_v60 }
 0x2dc   :  { %2434 = vst [vmem:[#allocation8 + $0x768] sm:$0xff] %v1263_v53  ;;  %3025 = vmatmul.msk.f32.gmra.mxu2 %vm82_vm0, %v4163_v41  ;;  %3057 = vmatmul.msk.f32.gmra.mxu3 %vm82_vm0, %v4163_v41  ;;  %v4273_v53 = vld [vmem:[#allocation2 + $0x98] sm:$0xff] }
 0x2dd   :  { %3087 = vmatmul.msk.f32.gmra.mxu0 %vm82_vm0, %v4143_v18  ;;  %3119 = vmatmul.msk.f32.gmra.mxu1 %vm82_vm0, %v4143_v18 }
 0x2df   :  { %v930_v61 = vpop.f32.mrf.mxu2  ;;  %v1043_v23 = vpop.f32.mrf.mxu3 }
 0x2e0   :  { %2373 = vst [vmem:[#allocation8 + $0x580] sm:$0xff] %v930_v61 }
 0x2e1   :  { %2374 = vst [vmem:[#allocation8 + $0x588] sm:$0xff] %v1043_v23 }
 0x2e2   :  { %v1153_v25 = vpop.f32.mrf.mxu0  ;;  %v1266_v48 = vpop.f32.mrf.mxu1 }
 0x2e3   :  { %2435 = vst [vmem:[#allocation8 + $0x770] sm:$0xff] %v1153_v25 }
 0x2e4   :  { %2436 = vst [vmem:[#allocation8 + $0x778] sm:$0xff] %v1266_v48  ;;  %3026 = vmatmul.msk.f32.gmra.mxu2 %vm82_vm0, %v4173_v54  ;;  %3058 = vmatmul.msk.f32.gmra.mxu3 %vm82_vm0, %v4173_v54 }
 0x2e5   :  { %3088 = vmatmul.msk.f32.gmra.mxu0 %vm82_vm0, %v4153_v56  ;;  %3120 = vmatmul.msk.f32.gmra.mxu1 %vm82_vm0, %v4153_v56 }
 0x2e7   :  { %v933_v29 = vpop.f32.mrf.mxu2  ;;  %v1046_v31 = vpop.f32.mrf.mxu3 }
 0x2e8   :  { %2375 = vst [vmem:[#allocation8 + $0x590] sm:$0xff] %v933_v29  ;;  %v4283_v29 = vld [vmem:[#allocation2 + $0xa0] sm:$0xff] }
 0x2e9   :  { %2376 = vst [vmem:[#allocation8 + $0x598] sm:$0xff] %v1046_v31 }
 0x2ea   :  { %v1156_v6 = vpop.f32.mrf.mxu0  ;;  %v1269_v24 = vpop.f32.mrf.mxu1 }
 0x2eb   :  { %2437 = vst [vmem:[#allocation8 + $0x780] sm:$0xff] %v1156_v6 }
 0x2ec   :  { %2438 = vst [vmem:[#allocation8 + $0x788] sm:$0xff] %v1269_v24  ;;  %3027 = vmatmul.msk.f32.gmra.mxu2 %vm82_vm0, %v4183_v55  ;;  %3059 = vmatmul.msk.f32.gmra.mxu3 %vm82_vm0, %v4183_v55 }
 0x2ed   :  { %3089 = vmatmul.msk.f32.gmra.mxu0 %vm82_vm0, %v4163_v41  ;;  %3121 = vmatmul.msk.f32.gmra.mxu1 %vm82_vm0, %v4163_v41 }
 0x2ef   :  { %v936_v63 = vpop.f32.mrf.mxu2  ;;  %v1049_v13 = vpop.f32.mrf.mxu3 }
 0x2f0   :  { %2377 = vst [vmem:[#allocation8 + $0x5a0] sm:$0xff] %v936_v63 }
 0x2f1   :  { %2378 = vst [vmem:[#allocation8 + $0x5a8] sm:$0xff] %v1049_v13  ;;  %v4293_v13 = vld [vmem:[#allocation2 + $0xa8] sm:$0xff] }
 0x2f2   :  { %v1159_v0 = vpop.f32.mrf.mxu0  ;;  %v1272_v2 = vpop.f32.mrf.mxu1 }
 0x2f3   :  { %2439 = vst [vmem:[#allocation8 + $0x790] sm:$0xff] %v1159_v0 }
 0x2f4   :  { %2440 = vst [vmem:[#allocation8 + $0x798] sm:$0xff] %v1272_v2  ;;  %3028 = vmatmul.msk.f32.gmra.mxu2 %vm82_vm0, %v4193_v58  ;;  %3060 = vmatmul.msk.f32.gmra.mxu3 %vm82_vm0, %v4193_v58 }
 0x2f5   :  { %3090 = vmatmul.msk.f32.gmra.mxu0 %vm82_vm0, %v4173_v54  ;;  %3122 = vmatmul.msk.f32.gmra.mxu1 %vm82_vm0, %v4173_v54 }
 0x2f7   :  { %v939_v19 = vpop.f32.mrf.mxu2  ;;  %v1052_v27 = vpop.f32.mrf.mxu3 }
 0x2f8   :  { %2379 = vst [vmem:[#allocation8 + $0x5b0] sm:$0xff] %v939_v19 }
 0x2f9   :  { %2380 = vst [vmem:[#allocation8 + $0x5b8] sm:$0xff] %v1052_v27 }
 0x2fa   :  { %v1162_v3 = vpop.f32.mrf.mxu0  ;;  %v1275_v32 = vpop.f32.mrf.mxu1 }
 0x2fb   :  { %2441 = vst [vmem:[#allocation8 + $0x7a0] sm:$0xff] %v1162_v3  ;;  %v4303_v3 = vld [vmem:[#allocation2 + $0xb0] sm:$0xff] }
 0x2fc   :  { %2442 = vst [vmem:[#allocation8 + $0x7a8] sm:$0xff] %v1275_v32  ;;  %3029 = vmatmul.msk.f32.gmra.mxu2 %vm82_vm0, %v4203_v28  ;;  %3061 = vmatmul.msk.f32.gmra.mxu3 %vm82_vm0, %v4203_v28 }
 0x2fd   :  { %3091 = vmatmul.msk.f32.gmra.mxu0 %vm82_vm0, %v4183_v55  ;;  %3123 = vmatmul.msk.f32.gmra.mxu1 %vm82_vm0, %v4183_v55 }
 0x2ff   :  { %v942_v59 = vpop.f32.mrf.mxu2  ;;  %v1055_v35 = vpop.f32.mrf.mxu3 }
 0x300   :  { %2381 = vst [vmem:[#allocation8 + $0x5c0] sm:$0xff] %v942_v59 }
 0x301   :  { %2382 = vst [vmem:[#allocation8 + $0x5c8] sm:$0xff] %v1055_v35 }
 0x302   :  { %v1165_v30 = vpop.f32.mrf.mxu0  ;;  %v1278_v37 = vpop.f32.mrf.mxu1 }
 0x303   :  { %2443 = vst [vmem:[#allocation8 + $0x7b0] sm:$0xff] %v1165_v30 }
 0x304   :  { %2444 = vst [vmem:[#allocation8 + $0x7b8] sm:$0xff] %v1278_v37  ;;  %3030 = vmatmul.msk.f32.gmra.mxu2 %vm82_vm0, %v4213_v62  ;;  %3062 = vmatmul.msk.f32.gmra.mxu3 %vm82_vm0, %v4213_v62  ;;  %v4313_v37 = vld [vmem:[#allocation2 + $0xb8] sm:$0xff] }
 0x305   :  { %3092 = vmatmul.msk.f32.gmra.mxu0 %vm82_vm0, %v4193_v58  ;;  %3124 = vmatmul.msk.f32.gmra.mxu1 %vm82_vm0, %v4193_v58 }
 0x307   :  { %v945_v40 = vpop.f32.mrf.mxu2  ;;  %v1058_v42 = vpop.f32.mrf.mxu3 }
 0x308   :  { %2383 = vst [vmem:[#allocation8 + $0x5d0] sm:$0xff] %v945_v40 }
 0x309   :  { %2384 = vst [vmem:[#allocation8 + $0x5d8] sm:$0xff] %v1058_v42 }
 0x30a   :  { %v1168_v45 = vpop.f32.mrf.mxu0  ;;  %v1281_v1 = vpop.f32.mrf.mxu1 }
 0x30b   :  { %2445 = vst [vmem:[#allocation8 + $0x7c0] sm:$0xff] %v1168_v45 }
 0x30c   :  { %2446 = vst [vmem:[#allocation8 + $0x7c8] sm:$0xff] %v1281_v1  ;;  %3031 = vmatmul.msk.f32.gmra.mxu2 %vm82_vm0, %v4223_v43  ;;  %3063 = vmatmul.msk.f32.gmra.mxu3 %vm82_vm0, %v4223_v43 }
 0x30d   :  { %3093 = vmatmul.msk.f32.gmra.mxu0 %vm82_vm0, %v4203_v28  ;;  %3125 = vmatmul.msk.f32.gmra.mxu1 %vm82_vm0, %v4203_v28 }
 0x30f   :  { %v948_v46 = vpop.f32.mrf.mxu2  ;;  %v1061_v5 = vpop.f32.mrf.mxu3 }
 0x310   :  { %2385 = vst [vmem:[#allocation8 + $0x5e0] sm:$0xff] %v948_v46  ;;  %v4323_v46 = vld [vmem:[#allocation2 + $0xc0] sm:$0xff] }
 0x311   :  { %2386 = vst [vmem:[#allocation8 + $0x5e8] sm:$0xff] %v1061_v5 }
 0x312   :  { %v1171_v4 = vpop.f32.mrf.mxu0  ;;  %v1284_v36 = vpop.f32.mrf.mxu1 }
 0x313   :  { %2447 = vst [vmem:[#allocation8 + $0x7d0] sm:$0xff] %v1171_v4 }
 0x314   :  { %2448 = vst [vmem:[#allocation8 + $0x7d8] sm:$0xff] %v1284_v36  ;;  %3032 = vmatmul.msk.f32.gmra.mxu2 %vm82_vm0, %v4233_v51  ;;  %3064 = vmatmul.msk.f32.gmra.mxu3 %vm82_vm0, %v4233_v51 }
 0x315   :  { %3094 = vmatmul.msk.f32.gmra.mxu0 %vm82_vm0, %v4213_v62  ;;  %3126 = vmatmul.msk.f32.gmra.mxu1 %vm82_vm0, %v4213_v62 }
 0x317   :  { %v951_v7 = vpop.f32.mrf.mxu2  ;;  %v1064_v8 = vpop.f32.mrf.mxu3 }
 0x318   :  { %2387 = vst [vmem:[#allocation8 + $0x5f0] sm:$0xff] %v951_v7 }
 0x319   :  { %2388 = vst [vmem:[#allocation8 + $0x5f8] sm:$0xff] %v1064_v8  ;;  %v4333_v8 = vld [vmem:[#allocation2 + $0xc8] sm:$0xff] }
 0x31a   :  { %v1174_v39 = vpop.f32.mrf.mxu0  ;;  %v1287_v9 = vpop.f32.mrf.mxu1 }
 0x31b   :  { %2449 = vst [vmem:[#allocation8 + $0x7e0] sm:$0xff] %v1174_v39 }
 0x31c   :  { %2450 = vst [vmem:[#allocation8 + $0x7e8] sm:$0xff] %v1287_v9  ;;  %3033 = vmatmul.msk.f32.gmra.mxu2 %vm82_vm0, %v4243_v11  ;;  %3065 = vmatmul.msk.f32.gmra.mxu3 %vm82_vm0, %v4243_v11 }
 0x31d   :  { %3095 = vmatmul.msk.f32.gmra.mxu0 %vm82_vm0, %v4223_v43  ;;  %3127 = vmatmul.msk.f32.gmra.mxu1 %vm82_vm0, %v4223_v43 }
 0x31f   :  { %v1310_v12 = vpop.f32.mrf.mxu2  ;;  %v1423_v44 = vpop.f32.mrf.mxu3 }
 0x320   :  { %2453 = vst [vmem:[#allocation8 + $0x800] sm:$0xff] %v1310_v12 }
 0x321   :  { %2454 = vst [vmem:[#allocation8 + $0x808] sm:$0xff] %v1423_v44 }
 0x322   :  { %v1177_v15 = vpop.f32.mrf.mxu0  ;;  %v1290_v16 = vpop.f32.mrf.mxu1 }
 0x323   :  { %2451 = vst [vmem:[#allocation8 + $0x7f0] sm:$0xff] %v1177_v15  ;;  %v4343_v15 = vld [vmem:[#allocation2 + $0xd0] sm:$0xff] }
 0x324   :  { %2452 = vst [vmem:[#allocation8 + $0x7f8] sm:$0xff] %v1290_v16  ;;  %3034 = vmatmul.msk.f32.gmra.mxu2 %vm82_vm0, %v4253_v17  ;;  %3066 = vmatmul.msk.f32.gmra.mxu3 %vm82_vm0, %v4253_v17 }
 0x325   :  { %3096 = vmatmul.msk.f32.gmra.mxu0 %vm82_vm0, %v4233_v51  ;;  %3128 = vmatmul.msk.f32.gmra.mxu1 %vm82_vm0, %v4233_v51 }
 0x327   :  { %v1313_v20 = vpop.f32.mrf.mxu2  ;;  %v1426_v47 = vpop.f32.mrf.mxu3 }
 0x328   :  { %2455 = vst [vmem:[#allocation8 + $0x810] sm:$0xff] %v1313_v20 }
 0x329   :  { %2456 = vst [vmem:[#allocation8 + $0x818] sm:$0xff] %v1426_v47 }
 0x32a   :  { %v1536_v21 = vpop.f32.mrf.mxu0  ;;  %v1649_v26 = vpop.f32.mrf.mxu1 }
 0x32b   :  { %2517 = vst [vmem:[#allocation8 + $0xa00] sm:$0xff] %v1536_v21 }
 0x32c   :  { %2518 = vst [vmem:[#allocation8 + $0xa08] sm:$0xff] %v1649_v26  ;;  %3035 = vmatmul.msk.f32.gmra.mxu2 %vm82_vm0, %v4263_v22  ;;  %3067 = vmatmul.msk.f32.gmra.mxu3 %vm82_vm0, %v4263_v22  ;;  %v4353_v26 = vld [vmem:[#allocation2 + $0xd8] sm:$0xff] }
 0x32d   :  { %3097 = vmatmul.msk.f32.gmra.mxu0 %vm82_vm0, %v4243_v11  ;;  %3129 = vmatmul.msk.f32.gmra.mxu1 %vm82_vm0, %v4243_v11 }
 0x32f   :  { %v1316_v50 = vpop.f32.mrf.mxu2  ;;  %v1429_v34 = vpop.f32.mrf.mxu3 }
 0x330   :  { %2457 = vst [vmem:[#allocation8 + $0x820] sm:$0xff] %v1316_v50 }
 0x331   :  { %2458 = vst [vmem:[#allocation8 + $0x828] sm:$0xff] %v1429_v34 }
 0x332   :  { %v1539_v57 = vpop.f32.mrf.mxu0  ;;  %v1652_v60 = vpop.f32.mrf.mxu1 }
 0x333   :  { %2519 = vst [vmem:[#allocation8 + $0xa10] sm:$0xff] %v1539_v57 }
 0x334   :  { %2520 = vst [vmem:[#allocation8 + $0xa18] sm:$0xff] %v1652_v60  ;;  %3036 = vmatmul.msk.f32.gmra.mxu2 %vm82_vm0, %v4273_v53  ;;  %3068 = vmatmul.msk.f32.gmra.mxu3 %vm82_vm0, %v4273_v53 }
 0x335   :  { %3098 = vmatmul.msk.f32.gmra.mxu0 %vm82_vm0, %v4253_v17  ;;  %3130 = vmatmul.msk.f32.gmra.mxu1 %vm82_vm0, %v4253_v17 }
 0x337   :  { %v1319_v61 = vpop.f32.mrf.mxu2  ;;  %v1432_v23 = vpop.f32.mrf.mxu3 }
 0x338   :  { %2459 = vst [vmem:[#allocation8 + $0x830] sm:$0xff] %v1319_v61  ;;  %v4363_v61 = vld [vmem:[#allocation2 + $0xe0] sm:$0xff] }
 0x339   :  { %2460 = vst [vmem:[#allocation8 + $0x838] sm:$0xff] %v1432_v23 }
 0x33a   :  { %v1542_v25 = vpop.f32.mrf.mxu0  ;;  %v1655_v48 = vpop.f32.mrf.mxu1 }
 0x33b   :  { %2521 = vst [vmem:[#allocation8 + $0xa20] sm:$0xff] %v1542_v25 }
 0x33c   :  { %2522 = vst [vmem:[#allocation8 + $0xa28] sm:$0xff] %v1655_v48  ;;  %3037 = vmatmul.msk.f32.gmra.mxu2 %vm82_vm0, %v4283_v29  ;;  %3069 = vmatmul.msk.f32.gmra.mxu3 %vm82_vm0, %v4283_v29 }
 0x33d   :  { %3099 = vmatmul.msk.f32.gmra.mxu0 %vm82_vm0, %v4263_v22  ;;  %3131 = vmatmul.msk.f32.gmra.mxu1 %vm82_vm0, %v4263_v22 }
 0x33f   :  { %v1322_v31 = vpop.f32.mrf.mxu2  ;;  %v1435_v6 = vpop.f32.mrf.mxu3 }
 0x340   :  { %2461 = vst [vmem:[#allocation8 + $0x840] sm:$0xff] %v1322_v31 }
 0x341   :  { %2462 = vst [vmem:[#allocation8 + $0x848] sm:$0xff] %v1435_v6  ;;  %v4373_v6 = vld [vmem:[#allocation2 + $0xe8] sm:$0xff] }
 0x342   :  { %v1545_v24 = vpop.f32.mrf.mxu0  ;;  %v1658_v63 = vpop.f32.mrf.mxu1 }
 0x343   :  { %2523 = vst [vmem:[#allocation8 + $0xa30] sm:$0xff] %v1545_v24 }
 0x344   :  { %2524 = vst [vmem:[#allocation8 + $0xa38] sm:$0xff] %v1658_v63  ;;  %3038 = vmatmul.msk.f32.gmra.mxu2 %vm82_vm0, %v4293_v13  ;;  %3070 = vmatmul.msk.f32.gmra.mxu3 %vm82_vm0, %v4293_v13 }
 0x345   :  { %3100 = vmatmul.msk.f32.gmra.mxu0 %vm82_vm0, %v4273_v53  ;;  %3132 = vmatmul.msk.f32.gmra.mxu1 %vm82_vm0, %v4273_v53 }
 0x347   :  { %v1325_v0 = vpop.f32.mrf.mxu2  ;;  %v1438_v2 = vpop.f32.mrf.mxu3 }
 0x348   :  { %2463 = vst [vmem:[#allocation8 + $0x850] sm:$0xff] %v1325_v0 }
 0x349   :  { %2464 = vst [vmem:[#allocation8 + $0x858] sm:$0xff] %v1438_v2 }
 0x34a   :  { %v1548_v19 = vpop.f32.mrf.mxu0  ;;  %v1661_v27 = vpop.f32.mrf.mxu1 }
 0x34b   :  { %2525 = vst [vmem:[#allocation8 + $0xa40] sm:$0xff] %v1548_v19  ;;  %v4383_v19 = vld [vmem:[#allocation2 + $0xf0] sm:$0xff] }
 0x34c   :  { %2526 = vst [vmem:[#allocation8 + $0xa48] sm:$0xff] %v1661_v27  ;;  %3039 = vmatmul.msk.f32.gmra.mxu2 %vm82_vm0, %v4303_v3  ;;  %3071 = vmatmul.msk.f32.gmra.mxu3 %vm82_vm0, %v4303_v3 }
 0x34d   :  { %3101 = vmatmul.msk.f32.gmra.mxu0 %vm82_vm0, %v4283_v29  ;;  %3133 = vmatmul.msk.f32.gmra.mxu1 %vm82_vm0, %v4283_v29 }
 0x34f   :  { %v1328_v32 = vpop.f32.mrf.mxu2  ;;  %v1441_v59 = vpop.f32.mrf.mxu3 }
 0x350   :  { %2465 = vst [vmem:[#allocation8 + $0x860] sm:$0xff] %v1328_v32 }
 0x351   :  { %2466 = vst [vmem:[#allocation8 + $0x868] sm:$0xff] %v1441_v59 }
 0x352   :  { %v1551_v35 = vpop.f32.mrf.mxu0  ;;  %v1664_v30 = vpop.f32.mrf.mxu1 }
 0x353   :  { %2527 = vst [vmem:[#allocation8 + $0xa50] sm:$0xff] %v1551_v35 }
 0x354   :  { %2528 = vst [vmem:[#allocation8 + $0xa58] sm:$0xff] %v1664_v30  ;;  %3040 = vmatmul.msk.f32.gmra.mxu2 %vm82_vm0, %v4313_v37  ;;  %3072 = vmatmul.msk.f32.gmra.mxu3 %vm82_vm0, %v4313_v37  ;;  %v4393_v30 = vld [vmem:[#allocation2 + $0xf8] sm:$0xff] }
 0x355   :  { %3102 = vmatmul.msk.f32.gmra.mxu0 %vm82_vm0, %v4293_v13  ;;  %3134 = vmatmul.msk.f32.gmra.mxu1 %vm82_vm0, %v4293_v13 }
 0x357   :  { %v1331_v40 = vpop.f32.mrf.mxu2  ;;  %v1444_v42 = vpop.f32.mrf.mxu3 }
 0x358   :  { %2467 = vst [vmem:[#allocation8 + $0x870] sm:$0xff] %v1331_v40 }
 0x359   :  { %2468 = vst [vmem:[#allocation8 + $0x878] sm:$0xff] %v1444_v42 }
 0x35a   :  { %v1554_v45 = vpop.f32.mrf.mxu0  ;;  %v1667_v1 = vpop.f32.mrf.mxu1 }
 0x35b   :  { %2529 = vst [vmem:[#allocation8 + $0xa60] sm:$0xff] %v1554_v45 }
 0x35c   :  { %2530 = vst [vmem:[#allocation8 + $0xa68] sm:$0xff] %v1667_v1  ;;  %3041 = vmatmul.msk.f32.gmra.mxu2 %vm82_vm0, %v4323_v46  ;;  %3073 = vmatmul.msk.f32.gmra.mxu3 %vm82_vm0, %v4323_v46 }
 0x35d   :  { %3103 = vmatmul.msk.f32.gmra.mxu0 %vm82_vm0, %v4303_v3  ;;  %3135 = vmatmul.msk.f32.gmra.mxu1 %vm82_vm0, %v4303_v3 }
 0x35f   :  { %v1334_v5 = vpop.f32.mrf.mxu2  ;;  %v1447_v4 = vpop.f32.mrf.mxu3 }
 0x360   :  { %2469 = vst [vmem:[#allocation8 + $0x880] sm:$0xff] %v1334_v5 }
 0x361   :  { %2470 = vst [vmem:[#allocation8 + $0x888] sm:$0xff] %v1447_v4 }
 0x362   :  { %v1557_v36 = vpop.f32.mrf.mxu0  ;;  %v1670_v7 = vpop.f32.mrf.mxu1 }
 0x363   :  { %2531 = vst [vmem:[#allocation8 + $0xa70] sm:$0xff] %v1557_v36 }
 0x364   :  { %2532 = vst [vmem:[#allocation8 + $0xa78] sm:$0xff] %v1670_v7  ;;  %3042 = vmatmul.msk.f32.gmra.mxu2 %vm82_vm0, %v4333_v8  ;;  %3074 = vmatmul.msk.f32.gmra.mxu3 %vm82_vm0, %v4333_v8 }
 0x365   :  { %3104 = vmatmul.msk.f32.gmra.mxu0 %vm82_vm0, %v4313_v37  ;;  %3136 = vmatmul.msk.f32.gmra.mxu1 %vm82_vm0, %v4313_v37 }
 0x367   :  { %v1337_v39 = vpop.f32.mrf.mxu2  ;;  %v1450_v9 = vpop.f32.mrf.mxu3 }
 0x368   :  { %2471 = vst [vmem:[#allocation8 + $0x890] sm:$0xff] %v1337_v39 }
 0x369   :  { %2472 = vst [vmem:[#allocation8 + $0x898] sm:$0xff] %v1450_v9 }
 0x36a   :  { %v1560_v12 = vpop.f32.mrf.mxu0  ;;  %v1673_v44 = vpop.f32.mrf.mxu1 }
 0x36b   :  { %2533 = vst [vmem:[#allocation8 + $0xa80] sm:$0xff] %v1560_v12 }
 0x36c   :  { %2534 = vst [vmem:[#allocation8 + $0xa88] sm:$0xff] %v1673_v44  ;;  %3043 = vmatmul.msk.f32.gmra.mxu2 %vm82_vm0, %v4343_v15  ;;  %3075 = vmatmul.msk.f32.gmra.mxu3 %vm82_vm0, %v4343_v15 }
 0x36d   :  { %3105 = vmatmul.msk.f32.gmra.mxu0 %vm82_vm0, %v4323_v46  ;;  %3137 = vmatmul.msk.f32.gmra.mxu1 %vm82_vm0, %v4323_v46 }
 0x36f   :  { %v1340_v16 = vpop.f32.mrf.mxu2  ;;  %v1453_v20 = vpop.f32.mrf.mxu3 }
 0x370   :  { %2473 = vst [vmem:[#allocation8 + $0x8a0] sm:$0xff] %v1340_v16 }
 0x371   :  { %2474 = vst [vmem:[#allocation8 + $0x8a8] sm:$0xff] %v1453_v20 }
 0x372   :  { %v1563_v47 = vpop.f32.mrf.mxu0  ;;  %v1676_v21 = vpop.f32.mrf.mxu1 }
 0x373   :  { %2535 = vst [vmem:[#allocation8 + $0xa90] sm:$0xff] %v1563_v47 }
 0x374   :  { %2536 = vst [vmem:[#allocation8 + $0xa98] sm:$0xff] %v1676_v21  ;;  %3044 = vmatmul.msk.f32.gmra.mxu2 %vm82_vm0, %v4353_v26  ;;  %3076 = vmatmul.msk.f32.gmra.mxu3 %vm82_vm0, %v4353_v26 }
 0x375   :  { %3106 = vmatmul.msk.f32.gmra.mxu0 %vm82_vm0, %v4333_v8  ;;  %3138 = vmatmul.msk.f32.gmra.mxu1 %vm82_vm0, %v4333_v8 }
 0x377   :  { %v1343_v50 = vpop.f32.mrf.mxu2  ;;  %v1456_v34 = vpop.f32.mrf.mxu3 }
 0x378   :  { %2475 = vst [vmem:[#allocation8 + $0x8b0] sm:$0xff] %v1343_v50 }
 0x379   :  { %2476 = vst [vmem:[#allocation8 + $0x8b8] sm:$0xff] %v1456_v34 }
 0x37a   :  { %v1566_v57 = vpop.f32.mrf.mxu0  ;;  %v1679_v60 = vpop.f32.mrf.mxu1 }
 0x37b   :  { %2537 = vst [vmem:[#allocation8 + $0xaa0] sm:$0xff] %v1566_v57 }
 0x37c   :  { %2538 = vst [vmem:[#allocation8 + $0xaa8] sm:$0xff] %v1679_v60  ;;  %3045 = vmatmul.msk.f32.gmra.mxu2 %vm82_vm0, %v4363_v61  ;;  %3077 = vmatmul.msk.f32.gmra.mxu3 %vm82_vm0, %v4363_v61 }
 0x37d   :  { %3107 = vmatmul.msk.f32.gmra.mxu0 %vm82_vm0, %v4343_v15  ;;  %3139 = vmatmul.msk.f32.gmra.mxu1 %vm82_vm0, %v4343_v15 }
 0x37f   :  { %v1346_v23 = vpop.f32.mrf.mxu2  ;;  %v1459_v25 = vpop.f32.mrf.mxu3 }
 0x380   :  { %2477 = vst [vmem:[#allocation8 + $0x8c0] sm:$0xff] %v1346_v23 }
 0x381   :  { %2478 = vst [vmem:[#allocation8 + $0x8c8] sm:$0xff] %v1459_v25 }
 0x382   :  { %v1569_v48 = vpop.f32.mrf.mxu0  ;;  %v1682_v31 = vpop.f32.mrf.mxu1 }
 0x383   :  { %2539 = vst [vmem:[#allocation8 + $0xab0] sm:$0xff] %v1569_v48 }
 0x384   :  { %2540 = vst [vmem:[#allocation8 + $0xab8] sm:$0xff] %v1682_v31  ;;  %3046 = vmatmul.msk.f32.gmra.mxu2 %vm82_vm0, %v4373_v6  ;;  %3078 = vmatmul.msk.f32.gmra.mxu3 %vm82_vm0, %v4373_v6 }
 0x385   :  { %3108 = vmatmul.msk.f32.gmra.mxu0 %vm82_vm0, %v4353_v26  ;;  %3140 = vmatmul.msk.f32.gmra.mxu1 %vm82_vm0, %v4353_v26 }
 0x387   :  { %v1349_v24 = vpop.f32.mrf.mxu2  ;;  %v1462_v63 = vpop.f32.mrf.mxu3 }
 0x388   :  { %2479 = vst [vmem:[#allocation8 + $0x8d0] sm:$0xff] %v1349_v24 }
 0x389   :  { %2480 = vst [vmem:[#allocation8 + $0x8d8] sm:$0xff] %v1462_v63 }
 0x38a   :  { %v1572_v0 = vpop.f32.mrf.mxu0  ;;  %v1685_v2 = vpop.f32.mrf.mxu1 }
 0x38b   :  { %2541 = vst [vmem:[#allocation8 + $0xac0] sm:$0xff] %v1572_v0 }
 0x38c   :  { %2542 = vst [vmem:[#allocation8 + $0xac8] sm:$0xff] %v1685_v2  ;;  %3047 = vmatmul.msk.f32.gmra.mxu2 %vm82_vm0, %v4383_v19  ;;  %3079 = vmatmul.msk.f32.gmra.mxu3 %vm82_vm0, %v4383_v19 }
 0x38d   :  { %3109 = vmatmul.msk.f32.gmra.mxu0 %vm82_vm0, %v4363_v61  ;;  %3141 = vmatmul.msk.f32.gmra.mxu1 %vm82_vm0, %v4363_v61 }
 0x38f   :  { %v1352_v27 = vpop.f32.mrf.mxu2  ;;  %v1465_v32 = vpop.f32.mrf.mxu3 }
 0x390   :  { %2481 = vst [vmem:[#allocation8 + $0x8e0] sm:$0xff] %v1352_v27 }
 0x391   :  { %2482 = vst [vmem:[#allocation8 + $0x8e8] sm:$0xff] %v1465_v32 }
 0x392   :  { %v1575_v59 = vpop.f32.mrf.mxu0  ;;  %v1688_v35 = vpop.f32.mrf.mxu1 }
 0x393   :  { %2543 = vst [vmem:[#allocation8 + $0xad0] sm:$0xff] %v1575_v59 }
 0x394   :  { %2544 = vst [vmem:[#allocation8 + $0xad8] sm:$0xff] %v1688_v35  ;;  %3048 = vmatmul.msk.f32.gmra.mxu2 %vm82_vm0, %v4393_v30  ;;  %3080 = vmatmul.msk.f32.gmra.mxu3 %vm82_vm0, %v4393_v30 }
 0x395   :  { %3110 = vmatmul.msk.f32.gmra.mxu0 %vm82_vm0, %v4373_v6  ;;  %3142 = vmatmul.msk.f32.gmra.mxu1 %vm82_vm0, %v4373_v6 }
 0x397   :  { %v1355_v40 = vpop.f32.mrf.mxu2  ;;  %v1468_v42 = vpop.f32.mrf.mxu3 }
 0x398   :  { %2483 = vst [vmem:[#allocation8 + $0x8f0] sm:$0xff] %v1355_v40 }
 0x399   :  { %2484 = vst [vmem:[#allocation8 + $0x8f8] sm:$0xff] %v1468_v42 }
 0x39a   :  { %v1578_v45 = vpop.f32.mrf.mxu0  ;;  %v1691_v1 = vpop.f32.mrf.mxu1 }
 0x39b   :  { %2545 = vst [vmem:[#allocation8 + $0xae0] sm:$0xff] %v1578_v45 }
 0x39c   :  { %2546 = vst [vmem:[#allocation8 + $0xae8] sm:$0xff] %v1691_v1  ;;  %3145 = vmatmul.msk.f32.vlgmr.msra.gmra.mxu2 %vm82_vm0, %v4083_v38  ;;  %3177 = vmatmul.msk.f32.vlgmr.msra.gmra.mxu3 %vm82_vm0, %v4083_v38 }
 0x39d   :  { %3111 = vmatmul.msk.f32.gmra.mxu0 %vm82_vm0, %v4383_v19  ;;  %3143 = vmatmul.msk.f32.gmra.mxu1 %vm82_vm0, %v4383_v19 }
 0x39f   :  { %v1358_v5 = vpop.f32.mrf.mxu2  ;;  %v1471_v4 = vpop.f32.mrf.mxu3 }
 0x3a0   :  { %2485 = vst [vmem:[#allocation8 + $0x900] sm:$0xff] %v1358_v5 }
 0x3a1   :  { %2486 = vst [vmem:[#allocation8 + $0x908] sm:$0xff] %v1471_v4 }
 0x3a2   :  { %v1581_v36 = vpop.f32.mrf.mxu0  ;;  %v1694_v7 = vpop.f32.mrf.mxu1 }
 0x3a3   :  { %2547 = vst [vmem:[#allocation8 + $0xaf0] sm:$0xff] %v1581_v36 }
 0x3a4   :  { %2548 = vst [vmem:[#allocation8 + $0xaf8] sm:$0xff] %v1694_v7  ;;  %3146 = vmatmul.msk.f32.gmra.mxu2 %vm82_vm0, %v4093_v33  ;;  %3178 = vmatmul.msk.f32.gmra.mxu3 %vm82_vm0, %v4093_v33 }
 0x3a5   :  { %3112 = vmatmul.msk.f32.gmra.mxu0 %vm82_vm0, %v4393_v30  ;;  %3144 = vmatmul.msk.f32.gmra.mxu1 %vm82_vm0, %v4393_v30 }
 0x3a7   :  { %v1361_v39 = vpop.f32.mrf.mxu2  ;;  %v1474_v9 = vpop.f32.mrf.mxu3 }
 0x3a8   :  { %2487 = vst [vmem:[#allocation8 + $0x910] sm:$0xff] %v1361_v39 }
 0x3a9   :  { %2488 = vst [vmem:[#allocation8 + $0x918] sm:$0xff] %v1474_v9 }
 0x3aa   :  { %v1584_v12 = vpop.f32.mrf.mxu0  ;;  %v1697_v44 = vpop.f32.mrf.mxu1 }
 0x3ab   :  { %2549 = vst [vmem:[#allocation8 + $0xb00] sm:$0xff] %v1584_v12 }
 0x3ac   :  { %2550 = vst [vmem:[#allocation8 + $0xb08] sm:$0xff] %v1697_v44  ;;  %3147 = vmatmul.msk.f32.gmra.mxu2 %vm82_vm0, %v4103_v49  ;;  %3179 = vmatmul.msk.f32.gmra.mxu3 %vm82_vm0, %v4103_v49 }
 0x3ad   :  { %3209 = vmatmul.msk.f32.vlgmr.msra.gmra.mxu0 %vm82_vm0, %v4083_v38  ;;  %3241 = vmatmul.msk.f32.vlgmr.msra.gmra.mxu1 %vm82_vm0, %v4083_v38 }
 0x3af   :  { %v1364_v16 = vpop.f32.mrf.mxu2  ;;  %v1477_v20 = vpop.f32.mrf.mxu3 }
 0x3b0   :  { %2489 = vst [vmem:[#allocation8 + $0x920] sm:$0xff] %v1364_v16 }
 0x3b1   :  { %2490 = vst [vmem:[#allocation8 + $0x928] sm:$0xff] %v1477_v20 }
 0x3b2   :  { %v1587_v47 = vpop.f32.mrf.mxu0  ;;  %v1700_v21 = vpop.f32.mrf.mxu1 }
 0x3b3   :  { %2551 = vst [vmem:[#allocation8 + $0xb10] sm:$0xff] %v1587_v47 }
 0x3b4   :  { %2552 = vst [vmem:[#allocation8 + $0xb18] sm:$0xff] %v1700_v21  ;;  %3148 = vmatmul.msk.f32.gmra.mxu2 %vm82_vm0, %v4113_v52  ;;  %3180 = vmatmul.msk.f32.gmra.mxu3 %vm82_vm0, %v4113_v52 }
 0x3b5   :  { %3210 = vmatmul.msk.f32.gmra.mxu0 %vm82_vm0, %v4093_v33  ;;  %3242 = vmatmul.msk.f32.gmra.mxu1 %vm82_vm0, %v4093_v33 }
 0x3b7   :  { %v1367_v38 = vpop.f32.mrf.mxu2  ;;  %v1480_v50 = vpop.f32.mrf.mxu3 }
 0x3b8   :  { %2491 = vst [vmem:[#allocation8 + $0x930] sm:$0xff] %v1367_v38 }
 0x3b9   :  { %2492 = vst [vmem:[#allocation8 + $0x938] sm:$0xff] %v1480_v50 }
 0x3ba   :  { %v1590_v34 = vpop.f32.mrf.mxu0  ;;  %v1703_v57 = vpop.f32.mrf.mxu1 }
 0x3bb   :  { %2553 = vst [vmem:[#allocation8 + $0xb20] sm:$0xff] %v1590_v34 }
 0x3bc   :  { %2554 = vst [vmem:[#allocation8 + $0xb28] sm:$0xff] %v1703_v57  ;;  %3149 = vmatmul.msk.f32.gmra.mxu2 %vm82_vm0, %v4123_v10  ;;  %3181 = vmatmul.msk.f32.gmra.mxu3 %vm82_vm0, %v4123_v10 }
 0x3bd   :  { %3211 = vmatmul.msk.f32.gmra.mxu0 %vm82_vm0, %v4103_v49  ;;  %3243 = vmatmul.msk.f32.gmra.mxu1 %vm82_vm0, %v4103_v49 }
 0x3bf   :  { %v1370_v33 = vpop.f32.mrf.mxu2  ;;  %v1483_v60 = vpop.f32.mrf.mxu3 }
 0x3c0   :  { %2493 = vst [vmem:[#allocation8 + $0x940] sm:$0xff] %v1370_v33 }
 0x3c1   :  { %2494 = vst [vmem:[#allocation8 + $0x948] sm:$0xff] %v1483_v60 }
 0x3c2   :  { %v1593_v23 = vpop.f32.mrf.mxu0  ;;  %v1706_v25 = vpop.f32.mrf.mxu1 }
 0x3c3   :  { %2555 = vst [vmem:[#allocation8 + $0xb30] sm:$0xff] %v1593_v23 }
 0x3c4   :  { %2556 = vst [vmem:[#allocation8 + $0xb38] sm:$0xff] %v1706_v25  ;;  %3150 = vmatmul.msk.f32.gmra.mxu2 %vm82_vm0, %v4133_v14  ;;  %3182 = vmatmul.msk.f32.gmra.mxu3 %vm82_vm0, %v4133_v14 }
 0x3c5   :  { %3212 = vmatmul.msk.f32.gmra.mxu0 %vm82_vm0, %v4113_v52  ;;  %3244 = vmatmul.msk.f32.gmra.mxu1 %vm82_vm0, %v4113_v52 }
 0x3c7   :  { %v1373_v49 = vpop.f32.mrf.mxu2  ;;  %v1486_v48 = vpop.f32.mrf.mxu3 }
 0x3c8   :  { %2495 = vst [vmem:[#allocation8 + $0x950] sm:$0xff] %v1373_v49 }
 0x3c9   :  { %2496 = vst [vmem:[#allocation8 + $0x958] sm:$0xff] %v1486_v48 }
 0x3ca   :  { %v1596_v31 = vpop.f32.mrf.mxu0  ;;  %v1709_v24 = vpop.f32.mrf.mxu1 }
 0x3cb   :  { %2557 = vst [vmem:[#allocation8 + $0xb40] sm:$0xff] %v1596_v31 }
 0x3cc   :  { %2558 = vst [vmem:[#allocation8 + $0xb48] sm:$0xff] %v1709_v24  ;;  %3151 = vmatmul.msk.f32.gmra.mxu2 %vm82_vm0, %v4143_v18  ;;  %3183 = vmatmul.msk.f32.gmra.mxu3 %vm82_vm0, %v4143_v18 }
 0x3cd   :  { %3213 = vmatmul.msk.f32.gmra.mxu0 %vm82_vm0, %v4123_v10  ;;  %3245 = vmatmul.msk.f32.gmra.mxu1 %vm82_vm0, %v4123_v10 }
 0x3cf   :  { %v1376_v52 = vpop.f32.mrf.mxu2  ;;  %v1489_v63 = vpop.f32.mrf.mxu3 }
 0x3d0   :  { %2497 = vst [vmem:[#allocation8 + $0x960] sm:$0xff] %v1376_v52 }
 0x3d1   :  { %2498 = vst [vmem:[#allocation8 + $0x968] sm:$0xff] %v1489_v63 }
 0x3d2   :  { %v1599_v0 = vpop.f32.mrf.mxu0  ;;  %v1712_v2 = vpop.f32.mrf.mxu1 }
 0x3d3   :  { %2559 = vst [vmem:[#allocation8 + $0xb50] sm:$0xff] %v1599_v0 }
 0x3d4   :  { %2560 = vst [vmem:[#allocation8 + $0xb58] sm:$0xff] %v1712_v2  ;;  %3152 = vmatmul.msk.f32.gmra.mxu2 %vm82_vm0, %v4153_v56  ;;  %3184 = vmatmul.msk.f32.gmra.mxu3 %vm82_vm0, %v4153_v56 }
 0x3d5   :  { %3214 = vmatmul.msk.f32.gmra.mxu0 %vm82_vm0, %v4133_v14  ;;  %3246 = vmatmul.msk.f32.gmra.mxu1 %vm82_vm0, %v4133_v14 }
 0x3d7   :  { %v1379_v10 = vpop.f32.mrf.mxu2  ;;  %v1492_v27 = vpop.f32.mrf.mxu3 }
 0x3d8   :  { %2499 = vst [vmem:[#allocation8 + $0x970] sm:$0xff] %v1379_v10 }
 0x3d9   :  { %2500 = vst [vmem:[#allocation8 + $0x978] sm:$0xff] %v1492_v27 }
 0x3da   :  { %v1602_v32 = vpop.f32.mrf.mxu0  ;;  %v1715_v59 = vpop.f32.mrf.mxu1 }
 0x3db   :  { %2561 = vst [vmem:[#allocation8 + $0xb60] sm:$0xff] %v1602_v32 }
 0x3dc   :  { %2562 = vst [vmem:[#allocation8 + $0xb68] sm:$0xff] %v1715_v59  ;;  %3153 = vmatmul.msk.f32.gmra.mxu2 %vm82_vm0, %v4163_v41  ;;  %3185 = vmatmul.msk.f32.gmra.mxu3 %vm82_vm0, %v4163_v41 }
 0x3dd   :  { %3215 = vmatmul.msk.f32.gmra.mxu0 %vm82_vm0, %v4143_v18  ;;  %3247 = vmatmul.msk.f32.gmra.mxu1 %vm82_vm0, %v4143_v18 }
 0x3df   :  { %v1382_v14 = vpop.f32.mrf.mxu2  ;;  %v1495_v35 = vpop.f32.mrf.mxu3 }
 0x3e0   :  { %2501 = vst [vmem:[#allocation8 + $0x980] sm:$0xff] %v1382_v14 }
 0x3e1   :  { %2502 = vst [vmem:[#allocation8 + $0x988] sm:$0xff] %v1495_v35 }
 0x3e2   :  { %v1605_v40 = vpop.f32.mrf.mxu0  ;;  %v1718_v42 = vpop.f32.mrf.mxu1 }
 0x3e3   :  { %2563 = vst [vmem:[#allocation8 + $0xb70] sm:$0xff] %v1605_v40 }
 0x3e4   :  { %2564 = vst [vmem:[#allocation8 + $0xb78] sm:$0xff] %v1718_v42  ;;  %3154 = vmatmul.msk.f32.gmra.mxu2 %vm82_vm0, %v4173_v54  ;;  %3186 = vmatmul.msk.f32.gmra.mxu3 %vm82_vm0, %v4173_v54 }
 0x3e5   :  { %3216 = vmatmul.msk.f32.gmra.mxu0 %vm82_vm0, %v4153_v56  ;;  %3248 = vmatmul.msk.f32.gmra.mxu1 %vm82_vm0, %v4153_v56 }
 0x3e7   :  { %v1385_v18 = vpop.f32.mrf.mxu2  ;;  %v1498_v45 = vpop.f32.mrf.mxu3 }
 0x3e8   :  { %2503 = vst [vmem:[#allocation8 + $0x990] sm:$0xff] %v1385_v18 }
 0x3e9   :  { %2504 = vst [vmem:[#allocation8 + $0x998] sm:$0xff] %v1498_v45 }
 0x3ea   :  { %v1608_v1 = vpop.f32.mrf.mxu0  ;;  %v1721_v5 = vpop.f32.mrf.mxu1 }
 0x3eb   :  { %2565 = vst [vmem:[#allocation8 + $0xb80] sm:$0xff] %v1608_v1 }
 0x3ec   :  { %2566 = vst [vmem:[#allocation8 + $0xb88] sm:$0xff] %v1721_v5  ;;  %3155 = vmatmul.msk.f32.gmra.mxu2 %vm82_vm0, %v4183_v55  ;;  %3187 = vmatmul.msk.f32.gmra.mxu3 %vm82_vm0, %v4183_v55 }
 0x3ed   :  { %3217 = vmatmul.msk.f32.gmra.mxu0 %vm82_vm0, %v4163_v41  ;;  %3249 = vmatmul.msk.f32.gmra.mxu1 %vm82_vm0, %v4163_v41 }
 0x3ef   :  { %v1388_v56 = vpop.f32.mrf.mxu2  ;;  %v1501_v4 = vpop.f32.mrf.mxu3 }
 0x3f0   :  { %2505 = vst [vmem:[#allocation8 + $0x9a0] sm:$0xff] %v1388_v56 }
 0x3f1   :  { %2506 = vst [vmem:[#allocation8 + $0x9a8] sm:$0xff] %v1501_v4 }
 0x3f2   :  { %v1611_v36 = vpop.f32.mrf.mxu0  ;;  %v1724_v7 = vpop.f32.mrf.mxu1 }
 0x3f3   :  { %2567 = vst [vmem:[#allocation8 + $0xb90] sm:$0xff] %v1611_v36 }
 0x3f4   :  { %2568 = vst [vmem:[#allocation8 + $0xb98] sm:$0xff] %v1724_v7  ;;  %3156 = vmatmul.msk.f32.gmra.mxu2 %vm82_vm0, %v4193_v58  ;;  %3188 = vmatmul.msk.f32.gmra.mxu3 %vm82_vm0, %v4193_v58 }
 0x3f5   :  { %3218 = vmatmul.msk.f32.gmra.mxu0 %vm82_vm0, %v4173_v54  ;;  %3250 = vmatmul.msk.f32.gmra.mxu1 %vm82_vm0, %v4173_v54 }
 0x3f7   :  { %v1391_v41 = vpop.f32.mrf.mxu2  ;;  %v1504_v39 = vpop.f32.mrf.mxu3 }
 0x3f8   :  { %2507 = vst [vmem:[#allocation8 + $0x9b0] sm:$0xff] %v1391_v41 }
 0x3f9   :  { %2508 = vst [vmem:[#allocation8 + $0x9b8] sm:$0xff] %v1504_v39 }
 0x3fa   :  { %v1614_v9 = vpop.f32.mrf.mxu0  ;;  %v1727_v12 = vpop.f32.mrf.mxu1 }
 0x3fb   :  { %2569 = vst [vmem:[#allocation8 + $0xba0] sm:$0xff] %v1614_v9 }
 0x3fc   :  { %2570 = vst [vmem:[#allocation8 + $0xba8] sm:$0xff] %v1727_v12  ;;  %3157 = vmatmul.msk.f32.gmra.mxu2 %vm82_vm0, %v4203_v28  ;;  %3189 = vmatmul.msk.f32.gmra.mxu3 %vm82_vm0, %v4203_v28 }
 0x3fd   :  { %3219 = vmatmul.msk.f32.gmra.mxu0 %vm82_vm0, %v4183_v55  ;;  %3251 = vmatmul.msk.f32.gmra.mxu1 %vm82_vm0, %v4183_v55 }
 0x3ff   :  { %v1394_v54 = vpop.f32.mrf.mxu2  ;;  %v1507_v44 = vpop.f32.mrf.mxu3 }
 0x400   :  { %2509 = vst [vmem:[#allocation8 + $0x9c0] sm:$0xff] %v1394_v54 }
 0x401   :  { %2510 = vst [vmem:[#allocation8 + $0x9c8] sm:$0xff] %v1507_v44 }
 0x402   :  { %v1617_v16 = vpop.f32.mrf.mxu0  ;;  %v1730_v20 = vpop.f32.mrf.mxu1 }
 0x403   :  { %2571 = vst [vmem:[#allocation8 + $0xbb0] sm:$0xff] %v1617_v16 }
 0x404   :  { %2572 = vst [vmem:[#allocation8 + $0xbb8] sm:$0xff] %v1730_v20  ;;  %3158 = vmatmul.msk.f32.gmra.mxu2 %vm82_vm0, %v4213_v62  ;;  %3190 = vmatmul.msk.f32.gmra.mxu3 %vm82_vm0, %v4213_v62 }
 0x405   :  { %3220 = vmatmul.msk.f32.gmra.mxu0 %vm82_vm0, %v4193_v58  ;;  %3252 = vmatmul.msk.f32.gmra.mxu1 %vm82_vm0, %v4193_v58 }
 0x407   :  { %v1397_v55 = vpop.f32.mrf.mxu2  ;;  %v1510_v47 = vpop.f32.mrf.mxu3 }
 0x408   :  { %2511 = vst [vmem:[#allocation8 + $0x9d0] sm:$0xff] %v1397_v55 }
 0x409   :  { %2512 = vst [vmem:[#allocation8 + $0x9d8] sm:$0xff] %v1510_v47 }
 0x40a   :  { %v1620_v21 = vpop.f32.mrf.mxu0  ;;  %v1733_v38 = vpop.f32.mrf.mxu1 }
 0x40b   :  { %2573 = vst [vmem:[#allocation8 + $0xbc0] sm:$0xff] %v1620_v21 }
 0x40c   :  { %2574 = vst [vmem:[#allocation8 + $0xbc8] sm:$0xff] %v1733_v38  ;;  %3159 = vmatmul.msk.f32.gmra.mxu2 %vm82_vm0, %v4223_v43  ;;  %3191 = vmatmul.msk.f32.gmra.mxu3 %vm82_vm0, %v4223_v43 }
 0x40d   :  { %3221 = vmatmul.msk.f32.gmra.mxu0 %vm82_vm0, %v4203_v28  ;;  %3253 = vmatmul.msk.f32.gmra.mxu1 %vm82_vm0, %v4203_v28 }
 0x40f   :  { %v1400_v58 = vpop.f32.mrf.mxu2  ;;  %v1513_v50 = vpop.f32.mrf.mxu3 }
 0x410   :  { %2513 = vst [vmem:[#allocation8 + $0x9e0] sm:$0xff] %v1400_v58 }
 0x411   :  { %2514 = vst [vmem:[#allocation8 + $0x9e8] sm:$0xff] %v1513_v50 }
 0x412   :  { %v1623_v34 = vpop.f32.mrf.mxu0  ;;  %v1736_v57 = vpop.f32.mrf.mxu1 }
 0x413   :  { %2575 = vst [vmem:[#allocation8 + $0xbd0] sm:$0xff] %v1623_v34 }
 0x414   :  { %2576 = vst [vmem:[#allocation8 + $0xbd8] sm:$0xff] %v1736_v57  ;;  %3160 = vmatmul.msk.f32.gmra.mxu2 %vm82_vm0, %v4233_v51  ;;  %3192 = vmatmul.msk.f32.gmra.mxu3 %vm82_vm0, %v4233_v51 }
 0x415   :  { %3222 = vmatmul.msk.f32.gmra.mxu0 %vm82_vm0, %v4213_v62  ;;  %3254 = vmatmul.msk.f32.gmra.mxu1 %vm82_vm0, %v4213_v62 }
 0x417   :  { %v1403_v28 = vpop.f32.mrf.mxu2  ;;  %v1516_v33 = vpop.f32.mrf.mxu3 }
 0x418   :  { %2515 = vst [vmem:[#allocation8 + $0x9f0] sm:$0xff] %v1403_v28 }
 0x419   :  { %2516 = vst [vmem:[#allocation8 + $0x9f8] sm:$0xff] %v1516_v33 }
 0x41a   :  { %v1626_v60 = vpop.f32.mrf.mxu0  ;;  %v1739_v23 = vpop.f32.mrf.mxu1 }
 0x41b   :  { %2577 = vst [vmem:[#allocation8 + $0xbe0] sm:$0xff] %v1626_v60 }
 0x41c   :  { %2578 = vst [vmem:[#allocation8 + $0xbe8] sm:$0xff] %v1739_v23  ;;  %3161 = vmatmul.msk.f32.gmra.mxu2 %vm82_vm0, %v4243_v11  ;;  %3193 = vmatmul.msk.f32.gmra.mxu3 %vm82_vm0, %v4243_v11 }
 0x41d   :  { %3223 = vmatmul.msk.f32.gmra.mxu0 %vm82_vm0, %v4223_v43  ;;  %3255 = vmatmul.msk.f32.gmra.mxu1 %vm82_vm0, %v4223_v43 }
 0x41f   :  { %v1762_v62 = vpop.f32.mrf.mxu2  ;;  %v1875_v25 = vpop.f32.mrf.mxu3 }
 0x420   :  { %2581 = vst [vmem:[#allocation8 + $0xc00] sm:$0xff] %v1762_v62 }
 0x421   :  { %2582 = vst [vmem:[#allocation8 + $0xc08] sm:$0xff] %v1875_v25 }
 0x422   :  { %v1629_v49 = vpop.f32.mrf.mxu0  ;;  %v1742_v48 = vpop.f32.mrf.mxu1 }
 0x423   :  { %2579 = vst [vmem:[#allocation8 + $0xbf0] sm:$0xff] %v1629_v49 }
 0x424   :  { %2580 = vst [vmem:[#allocation8 + $0xbf8] sm:$0xff] %v1742_v48  ;;  %3162 = vmatmul.msk.f32.gmra.mxu2 %vm82_vm0, %v4253_v17  ;;  %3194 = vmatmul.msk.f32.gmra.mxu3 %vm82_vm0, %v4253_v17 }
 0x425   :  { %3224 = vmatmul.msk.f32.gmra.mxu0 %vm82_vm0, %v4233_v51  ;;  %3256 = vmatmul.msk.f32.gmra.mxu1 %vm82_vm0, %v4233_v51 }
 0x427   :  { %v1765_v43 = vpop.f32.mrf.mxu2  ;;  %v1878_v31 = vpop.f32.mrf.mxu3 }
 0x428   :  { %2583 = vst [vmem:[#allocation8 + $0xc10] sm:$0xff] %v1765_v43 }
 0x429   :  { %2584 = vst [vmem:[#allocation8 + $0xc18] sm:$0xff] %v1878_v31 }
 0x42a   :  { %v1988_v24 = vpop.f32.mrf.mxu0  ;;  %v2101_v52 = vpop.f32.mrf.mxu1 }
 0x42b   :  { %2645 = vst [vmem:[#allocation8 + $0xe00] sm:$0xff] %v1988_v24 }
 0x42c   :  { %2646 = vst [vmem:[#allocation8 + $0xe08] sm:$0xff] %v2101_v52  ;;  %3163 = vmatmul.msk.f32.gmra.mxu2 %vm82_vm0, %v4263_v22  ;;  %3195 = vmatmul.msk.f32.gmra.mxu3 %vm82_vm0, %v4263_v22 }
 0x42d   :  { %3225 = vmatmul.msk.f32.gmra.mxu0 %vm82_vm0, %v4243_v11  ;;  %3257 = vmatmul.msk.f32.gmra.mxu1 %vm82_vm0, %v4243_v11 }
 0x42f   :  { %v1768_v51 = vpop.f32.mrf.mxu2  ;;  %v1881_v63 = vpop.f32.mrf.mxu3 }
 0x430   :  { %2585 = vst [vmem:[#allocation8 + $0xc20] sm:$0xff] %v1768_v51 }
 0x431   :  { %2586 = vst [vmem:[#allocation8 + $0xc28] sm:$0xff] %v1881_v63 }
 0x432   :  { %v1991_v0 = vpop.f32.mrf.mxu0  ;;  %v2104_v2 = vpop.f32.mrf.mxu1 }
 0x433   :  { %2647 = vst [vmem:[#allocation8 + $0xe10] sm:$0xff] %v1991_v0 }
 0x434   :  { %2648 = vst [vmem:[#allocation8 + $0xe18] sm:$0xff] %v2104_v2  ;;  %3164 = vmatmul.msk.f32.gmra.mxu2 %vm82_vm0, %v4273_v53  ;;  %3196 = vmatmul.msk.f32.gmra.mxu3 %vm82_vm0, %v4273_v53 }
 0x435   :  { %3226 = vmatmul.msk.f32.gmra.mxu0 %vm82_vm0, %v4253_v17  ;;  %3258 = vmatmul.msk.f32.gmra.mxu1 %vm82_vm0, %v4253_v17 }
 0x437   :  { %v1771_v11 = vpop.f32.mrf.mxu2  ;;  %v1884_v10 = vpop.f32.mrf.mxu3 }
 0x438   :  { %2587 = vst [vmem:[#allocation8 + $0xc30] sm:$0xff] %v1771_v11 }
 0x439   :  { %2588 = vst [vmem:[#allocation8 + $0xc38] sm:$0xff] %v1884_v10 }
 0x43a   :  { %v1994_v27 = vpop.f32.mrf.mxu0  ;;  %v2107_v32 = vpop.f32.mrf.mxu1 }
 0x43b   :  { %2649 = vst [vmem:[#allocation8 + $0xe20] sm:$0xff] %v1994_v27 }
 0x43c   :  { %2650 = vst [vmem:[#allocation8 + $0xe28] sm:$0xff] %v2107_v32  ;;  %3165 = vmatmul.msk.f32.gmra.mxu2 %vm82_vm0, %v4283_v29  ;;  %3197 = vmatmul.msk.f32.gmra.mxu3 %vm82_vm0, %v4283_v29 }
 0x43d   :  { %3227 = vmatmul.msk.f32.gmra.mxu0 %vm82_vm0, %v4263_v22  ;;  %3259 = vmatmul.msk.f32.gmra.mxu1 %vm82_vm0, %v4263_v22 }
 0x43f   :  { %v1774_v17 = vpop.f32.mrf.mxu2  ;;  %v1887_v59 = vpop.f32.mrf.mxu3 }
 0x440   :  { %2589 = vst [vmem:[#allocation8 + $0xc40] sm:$0xff] %v1774_v17 }
 0x441   :  { %2590 = vst [vmem:[#allocation8 + $0xc48] sm:$0xff] %v1887_v59 }
 0x442   :  { %v1997_v14 = vpop.f32.mrf.mxu0  ;;  %v2110_v35 = vpop.f32.mrf.mxu1 }
 0x443   :  { %2651 = vst [vmem:[#allocation8 + $0xe30] sm:$0xff] %v1997_v14 }
 0x444   :  { %2652 = vst [vmem:[#allocation8 + $0xe38] sm:$0xff] %v2110_v35  ;;  %3166 = vmatmul.msk.f32.gmra.mxu2 %vm82_vm0, %v4293_v13  ;;  %3198 = vmatmul.msk.f32.gmra.mxu3 %vm82_vm0, %v4293_v13 }
 0x445   :  { %3228 = vmatmul.msk.f32.gmra.mxu0 %vm82_vm0, %v4273_v53  ;;  %3260 = vmatmul.msk.f32.gmra.mxu1 %vm82_vm0, %v4273_v53 }
 0x447   :  { %v1777_v22 = vpop.f32.mrf.mxu2  ;;  %v1890_v40 = vpop.f32.mrf.mxu3 }
 0x448   :  { %2591 = vst [vmem:[#allocation8 + $0xc50] sm:$0xff] %v1777_v22 }
 0x449   :  { %2592 = vst [vmem:[#allocation8 + $0xc58] sm:$0xff] %v1890_v40 }
 0x44a   :  { %v2000_v42 = vpop.f32.mrf.mxu0  ;;  %v2113_v18 = vpop.f32.mrf.mxu1 }
 0x44b   :  { %2653 = vst [vmem:[#allocation8 + $0xe40] sm:$0xff] %v2000_v42 }
 0x44c   :  { %2654 = vst [vmem:[#allocation8 + $0xe48] sm:$0xff] %v2113_v18  ;;  %3167 = vmatmul.msk.f32.gmra.mxu2 %vm82_vm0, %v4303_v3  ;;  %3199 = vmatmul.msk.f32.gmra.mxu3 %vm82_vm0, %v4303_v3 }
 0x44d   :  { %3229 = vmatmul.msk.f32.gmra.mxu0 %vm82_vm0, %v4283_v29  ;;  %3261 = vmatmul.msk.f32.gmra.mxu1 %vm82_vm0, %v4283_v29 }
 0x44f   :  { %v1780_v53 = vpop.f32.mrf.mxu2  ;;  %v1893_v45 = vpop.f32.mrf.mxu3 }
 0x450   :  { %2593 = vst [vmem:[#allocation8 + $0xc60] sm:$0xff] %v1780_v53 }
 0x451   :  { %2594 = vst [vmem:[#allocation8 + $0xc68] sm:$0xff] %v1893_v45 }
 0x452   :  { %v2003_v1 = vpop.f32.mrf.mxu0  ;;  %v2116_v5 = vpop.f32.mrf.mxu1 }
 0x453   :  { %2655 = vst [vmem:[#allocation8 + $0xe50] sm:$0xff] %v2003_v1 }
 0x454   :  { %2656 = vst [vmem:[#allocation8 + $0xe58] sm:$0xff] %v2116_v5  ;;  %3168 = vmatmul.msk.f32.gmra.mxu2 %vm82_vm0, %v4313_v37  ;;  %3200 = vmatmul.msk.f32.gmra.mxu3 %vm82_vm0, %v4313_v37 }
 0x455   :  { %3230 = vmatmul.msk.f32.gmra.mxu0 %vm82_vm0, %v4293_v13  ;;  %3262 = vmatmul.msk.f32.gmra.mxu1 %vm82_vm0, %v4293_v13 }
 0x457   :  { %v1783_v29 = vpop.f32.mrf.mxu2  ;;  %v1896_v56 = vpop.f32.mrf.mxu3 }
 0x458   :  { %2595 = vst [vmem:[#allocation8 + $0xc70] sm:$0xff] %v1783_v29 }
 0x459   :  { %2596 = vst [vmem:[#allocation8 + $0xc78] sm:$0xff] %v1896_v56 }
 0x45a   :  { %v2006_v4 = vpop.f32.mrf.mxu0  ;;  %v2119_v36 = vpop.f32.mrf.mxu1 }
 0x45b   :  { %2657 = vst [vmem:[#allocation8 + $0xe60] sm:$0xff] %v2006_v4 }
 0x45c   :  { %2658 = vst [vmem:[#allocation8 + $0xe68] sm:$0xff] %v2119_v36  ;;  %3169 = vmatmul.msk.f32.gmra.mxu2 %vm82_vm0, %v4323_v46  ;;  %3201 = vmatmul.msk.f32.gmra.mxu3 %vm82_vm0, %v4323_v46 }
 0x45d   :  { %3231 = vmatmul.msk.f32.gmra.mxu0 %vm82_vm0, %v4303_v3  ;;  %3263 = vmatmul.msk.f32.gmra.mxu1 %vm82_vm0, %v4303_v3 }
 0x45f   :  { %v1786_v13 = vpop.f32.mrf.mxu2  ;;  %v1899_v7 = vpop.f32.mrf.mxu3 }
 0x460   :  { %2597 = vst [vmem:[#allocation8 + $0xc80] sm:$0xff] %v1786_v13 }
 0x461   :  { %2598 = vst [vmem:[#allocation8 + $0xc88] sm:$0xff] %v1899_v7 }
 0x462   :  { %v2009_v41 = vpop.f32.mrf.mxu0  ;;  %v2122_v39 = vpop.f32.mrf.mxu1 }
 0x463   :  { %2659 = vst [vmem:[#allocation8 + $0xe70] sm:$0xff] %v2009_v41 }
 0x464   :  { %2660 = vst [vmem:[#allocation8 + $0xe78] sm:$0xff] %v2122_v39  ;;  %3170 = vmatmul.msk.f32.gmra.mxu2 %vm82_vm0, %v4333_v8  ;;  %3202 = vmatmul.msk.f32.gmra.mxu3 %vm82_vm0, %v4333_v8 }
 0x465   :  { %3232 = vmatmul.msk.f32.gmra.mxu0 %vm82_vm0, %v4313_v37  ;;  %3264 = vmatmul.msk.f32.gmra.mxu1 %vm82_vm0, %v4313_v37 }
 0x467   :  { %v1789_v3 = vpop.f32.mrf.mxu2  ;;  %v1902_v9 = vpop.f32.mrf.mxu3 }
 0x468   :  { %2599 = vst [vmem:[#allocation8 + $0xc90] sm:$0xff] %v1789_v3 }
 0x469   :  { %2600 = vst [vmem:[#allocation8 + $0xc98] sm:$0xff] %v1902_v9 }
 0x46a   :  { %v2012_v12 = vpop.f32.mrf.mxu0  ;;  %v2125_v54 = vpop.f32.mrf.mxu1 }
 0x46b   :  { %2661 = vst [vmem:[#allocation8 + $0xe80] sm:$0xff] %v2012_v12 }
 0x46c   :  { %2662 = vst [vmem:[#allocation8 + $0xe88] sm:$0xff] %v2125_v54  ;;  %3171 = vmatmul.msk.f32.gmra.mxu2 %vm82_vm0, %v4343_v15  ;;  %3203 = vmatmul.msk.f32.gmra.mxu3 %vm82_vm0, %v4343_v15 }
 0x46d   :  { %3233 = vmatmul.msk.f32.gmra.mxu0 %vm82_vm0, %v4323_v46  ;;  %3265 = vmatmul.msk.f32.gmra.mxu1 %vm82_vm0, %v4323_v46 }
 0x46f   :  { %v1792_v37 = vpop.f32.mrf.mxu2  ;;  %v1905_v44 = vpop.f32.mrf.mxu3 }
 0x470   :  { %2601 = vst [vmem:[#allocation8 + $0xca0] sm:$0xff] %v1792_v37 }
 0x471   :  { %2602 = vst [vmem:[#allocation8 + $0xca8] sm:$0xff] %v1905_v44 }
 0x472   :  { %v2015_v16 = vpop.f32.mrf.mxu0  ;;  %v2128_v20 = vpop.f32.mrf.mxu1 }
 0x473   :  { %2663 = vst [vmem:[#allocation8 + $0xe90] sm:$0xff] %v2015_v16 }
 0x474   :  { %2664 = vst [vmem:[#allocation8 + $0xe98] sm:$0xff] %v2128_v20  ;;  %3172 = vmatmul.msk.f32.gmra.mxu2 %vm82_vm0, %v4353_v26  ;;  %3204 = vmatmul.msk.f32.gmra.mxu3 %vm82_vm0, %v4353_v26 }
 0x475   :  { %3234 = vmatmul.msk.f32.gmra.mxu0 %vm82_vm0, %v4333_v8  ;;  %3266 = vmatmul.msk.f32.gmra.mxu1 %vm82_vm0, %v4333_v8 }
 0x477   :  { %v1795_v46 = vpop.f32.mrf.mxu2  ;;  %v1908_v55 = vpop.f32.mrf.mxu3 }
 0x478   :  { %2603 = vst [vmem:[#allocation8 + $0xcb0] sm:$0xff] %v1795_v46 }
 0x479   :  { %2604 = vst [vmem:[#allocation8 + $0xcb8] sm:$0xff] %v1908_v55 }
 0x47a   :  { %v2018_v47 = vpop.f32.mrf.mxu0  ;;  %v2131_v21 = vpop.f32.mrf.mxu1 }
 0x47b   :  { %2665 = vst [vmem:[#allocation8 + $0xea0] sm:$0xff] %v2018_v47 }
 0x47c   :  { %2666 = vst [vmem:[#allocation8 + $0xea8] sm:$0xff] %v2131_v21  ;;  %3173 = vmatmul.msk.f32.gmra.mxu2 %vm82_vm0, %v4363_v61  ;;  %3205 = vmatmul.msk.f32.gmra.mxu3 %vm82_vm0, %v4363_v61 }
 0x47d   :  { %3235 = vmatmul.msk.f32.gmra.mxu0 %vm82_vm0, %v4343_v15  ;;  %3267 = vmatmul.msk.f32.gmra.mxu1 %vm82_vm0, %v4343_v15 }
 0x47f   :  { %v1798_v8 = vpop.f32.mrf.mxu2  ;;  %v1911_v38 = vpop.f32.mrf.mxu3 }
 0x480   :  { %2605 = vst [vmem:[#allocation8 + $0xcc0] sm:$0xff] %v1798_v8 }
 0x481   :  { %2606 = vst [vmem:[#allocation8 + $0xcc8] sm:$0xff] %v1911_v38 }
 0x482   :  { %v2021_v58 = vpop.f32.mrf.mxu0  ;;  %v2134_v50 = vpop.f32.mrf.mxu1 }
 0x483   :  { %2667 = vst [vmem:[#allocation8 + $0xeb0] sm:$0xff] %v2021_v58 }
 0x484   :  { %2668 = vst [vmem:[#allocation8 + $0xeb8] sm:$0xff] %v2134_v50  ;;  %3174 = vmatmul.msk.f32.gmra.mxu2 %vm82_vm0, %v4373_v6  ;;  %3206 = vmatmul.msk.f32.gmra.mxu3 %vm82_vm0, %v4373_v6 }
 0x485   :  { %3236 = vmatmul.msk.f32.gmra.mxu0 %vm82_vm0, %v4353_v26  ;;  %3268 = vmatmul.msk.f32.gmra.mxu1 %vm82_vm0, %v4353_v26 }
 0x487   :  { %v1801_v15 = vpop.f32.mrf.mxu2  ;;  %v1914_v34 = vpop.f32.mrf.mxu3 }
 0x488   :  { %2607 = vst [vmem:[#allocation8 + $0xcd0] sm:$0xff] %v1801_v15 }
 0x489   :  { %2608 = vst [vmem:[#allocation8 + $0xcd8] sm:$0xff] %v1914_v34 }
 0x48a   :  { %v2024_v57 = vpop.f32.mrf.mxu0  ;;  %v2137_v28 = vpop.f32.mrf.mxu1 }
 0x48b   :  { %2669 = vst [vmem:[#allocation8 + $0xec0] sm:$0xff] %v2024_v57 }
 0x48c   :  { %2670 = vst [vmem:[#allocation8 + $0xec8] sm:$0xff] %v2137_v28  ;;  %3175 = vmatmul.msk.f32.gmra.mxu2 %vm82_vm0, %v4383_v19  ;;  %3207 = vmatmul.msk.f32.gmra.mxu3 %vm82_vm0, %v4383_v19 }
 0x48d   :  { %3237 = vmatmul.msk.f32.gmra.mxu0 %vm82_vm0, %v4363_v61  ;;  %3269 = vmatmul.msk.f32.gmra.mxu1 %vm82_vm0, %v4363_v61 }
 0x48f   :  { %v1804_v26 = vpop.f32.mrf.mxu2  ;;  %v1917_v33 = vpop.f32.mrf.mxu3 }
 0x490   :  { %2609 = vst [vmem:[#allocation8 + $0xce0] sm:$0xff] %v1804_v26 }
 0x491   :  { %2610 = vst [vmem:[#allocation8 + $0xce8] sm:$0xff] %v1917_v33 }
 0x492   :  { %v2027_v60 = vpop.f32.mrf.mxu0  ;;  %v2140_v23 = vpop.f32.mrf.mxu1 }
 0x493   :  { %2671 = vst [vmem:[#allocation8 + $0xed0] sm:$0xff] %v2027_v60 }
 0x494   :  { %2672 = vst [vmem:[#allocation8 + $0xed8] sm:$0xff] %v2140_v23  ;;  %3176 = vmatmul.msk.f32.gmra.mxu2 %vm82_vm0, %v4393_v30  ;;  %3208 = vmatmul.msk.f32.gmra.mxu3 %vm82_vm0, %v4393_v30 }
 0x495   :  { %3238 = vmatmul.msk.f32.gmra.mxu0 %vm82_vm0, %v4373_v6  ;;  %3270 = vmatmul.msk.f32.gmra.mxu1 %vm82_vm0, %v4373_v6 }
 0x497   :  { %v1807_v61 = vpop.f32.mrf.mxu2  ;;  %v1920_v62 = vpop.f32.mrf.mxu3 }
 0x498   :  { %2611 = vst [vmem:[#allocation8 + $0xcf0] sm:$0xff] %v1807_v61 }
 0x499   :  { %2612 = vst [vmem:[#allocation8 + $0xcf8] sm:$0xff] %v1920_v62 }
 0x49a   :  { %v2030_v25 = vpop.f32.mrf.mxu0  ;;  %v2143_v49 = vpop.f32.mrf.mxu1 }
 0x49b   :  { %2673 = vst [vmem:[#allocation8 + $0xee0] sm:$0xff] %v2030_v25 }
 0x49c   :  { %2674 = vst [vmem:[#allocation8 + $0xee8] sm:$0xff] %v2143_v49 }
 0x49d   :  { %3239 = vmatmul.msk.f32.gmra.mxu0 %vm82_vm0, %v4383_v19  ;;  %3271 = vmatmul.msk.f32.gmra.mxu1 %vm82_vm0, %v4383_v19 }
 0x49f   :  { %v1810_v48 = vpop.f32.mrf.mxu2  ;;  %v1923_v43 = vpop.f32.mrf.mxu3 }
 0x4a0   :  { %2613 = vst [vmem:[#allocation8 + $0xd00] sm:$0xff] %v1810_v48 }
 0x4a1   :  { %2614 = vst [vmem:[#allocation8 + $0xd08] sm:$0xff] %v1923_v43 }
 0x4a2   :  { %v2033_v31 = vpop.f32.mrf.mxu0  ;;  %v2146_v6 = vpop.f32.mrf.mxu1 }
 0x4a3   :  { %2675 = vst [vmem:[#allocation8 + $0xef0] sm:$0xff] %v2033_v31 }
 0x4a4   :  { %2676 = vst [vmem:[#allocation8 + $0xef8] sm:$0xff] %v2146_v6 }
 0x4a5   :  { %3240 = vmatmul.msk.f32.gmra.mxu0 %vm82_vm0, %v4393_v30  ;;  %3272 = vmatmul.msk.f32.gmra.mxu1 %vm82_vm0, %v4393_v30 }
 0x4a7   :  { %v1813_v24 = vpop.f32.mrf.mxu2  ;;  %v1926_v52 = vpop.f32.mrf.mxu3 }
 0x4a8   :  { %2615 = vst [vmem:[#allocation8 + $0xd10] sm:$0xff] %v1813_v24 }
 0x4a9   :  { %2616 = vst [vmem:[#allocation8 + $0xd18] sm:$0xff] %v1926_v52 }
 0x4aa   :  { %v2036_v51 = vpop.f32.mrf.mxu0  ;;  %v2149_v19 = vpop.f32.mrf.mxu1 }
 0x4ab   :  { %2677 = vst [vmem:[#allocation8 + $0xf00] sm:$0xff] %v2036_v51 }
 0x4ac   :  { %2678 = vst [vmem:[#allocation8 + $0xf08] sm:$0xff] %v2149_v19 }
 0x4af   :  { %v1816_v63 = vpop.f32.mrf.mxu2  ;;  %v1929_v0 = vpop.f32.mrf.mxu3 }
 0x4b0   :  { %2617 = vst [vmem:[#allocation8 + $0xd20] sm:$0xff] %v1816_v63 }
 0x4b1   :  { %2618 = vst [vmem:[#allocation8 + $0xd28] sm:$0xff] %v1929_v0 }
 0x4b2   :  { %v2039_v2 = vpop.f32.mrf.mxu0  ;;  %v2152_v11 = vpop.f32.mrf.mxu1 }
 0x4b3   :  { %2679 = vst [vmem:[#allocation8 + $0xf10] sm:$0xff] %v2039_v2 }
 0x4b4   :  { %2680 = vst [vmem:[#allocation8 + $0xf18] sm:$0xff] %v2152_v11 }
 0x4b7   :  { %v1819_v10 = vpop.f32.mrf.mxu2  ;;  %v1932_v27 = vpop.f32.mrf.mxu3 }
 0x4b8   :  { %2619 = vst [vmem:[#allocation8 + $0xd30] sm:$0xff] %v1819_v10 }
 0x4b9   :  { %2620 = vst [vmem:[#allocation8 + $0xd38] sm:$0xff] %v1932_v27 }
 0x4ba   :  { %v2042_v30 = vpop.f32.mrf.mxu0  ;;  %v2155_v32 = vpop.f32.mrf.mxu1 }
 0x4bb   :  { %2681 = vst [vmem:[#allocation8 + $0xf20] sm:$0xff] %v2042_v30 }
 0x4bc   :  { %2682 = vst [vmem:[#allocation8 + $0xf28] sm:$0xff] %v2155_v32 }
 0x4bf   :  { %v1822_v17 = vpop.f32.mrf.mxu2  ;;  %v1935_v59 = vpop.f32.mrf.mxu3 }
 0x4c0   :  { %2621 = vst [vmem:[#allocation8 + $0xd40] sm:$0xff] %v1822_v17 }
 0x4c1   :  { %2622 = vst [vmem:[#allocation8 + $0xd48] sm:$0xff] %v1935_v59 }
 0x4c2   :  { %v2045_v14 = vpop.f32.mrf.mxu0  ;;  %v2158_v35 = vpop.f32.mrf.mxu1 }
 0x4c3   :  { %2683 = vst [vmem:[#allocation8 + $0xf30] sm:$0xff] %v2045_v14 }
 0x4c4   :  { %2684 = vst [vmem:[#allocation8 + $0xf38] sm:$0xff] %v2158_v35 }
 0x4c7   :  { %v1825_v22 = vpop.f32.mrf.mxu2  ;;  %v1938_v40 = vpop.f32.mrf.mxu3 }
 0x4c8   :  { %2623 = vst [vmem:[#allocation8 + $0xd50] sm:$0xff] %v1825_v22 }
 0x4c9   :  { %2624 = vst [vmem:[#allocation8 + $0xd58] sm:$0xff] %v1938_v40 }
 0x4ca   :  { %v2048_v42 = vpop.f32.mrf.mxu0  ;;  %v2161_v18 = vpop.f32.mrf.mxu1 }
 0x4cb   :  { %2685 = vst [vmem:[#allocation8 + $0xf40] sm:$0xff] %v2048_v42 }
 0x4cc   :  { %2686 = vst [vmem:[#allocation8 + $0xf48] sm:$0xff] %v2161_v18 }
 0x4cf   :  { %v1828_v53 = vpop.f32.mrf.mxu2  ;;  %v1941_v45 = vpop.f32.mrf.mxu3 }
 0x4d0   :  { %2625 = vst [vmem:[#allocation8 + $0xd60] sm:$0xff] %v1828_v53 }
 0x4d1   :  { %2626 = vst [vmem:[#allocation8 + $0xd68] sm:$0xff] %v1941_v45 }
 0x4d2   :  { %v2051_v1 = vpop.f32.mrf.mxu0  ;;  %v2164_v5 = vpop.f32.mrf.mxu1 }
 0x4d3   :  { %2687 = vst [vmem:[#allocation8 + $0xf50] sm:$0xff] %v2051_v1 }
 0x4d4   :  { %2688 = vst [vmem:[#allocation8 + $0xf58] sm:$0xff] %v2164_v5 }
 0x4d7   :  { %v1831_v29 = vpop.f32.mrf.mxu2  ;;  %v1944_v56 = vpop.f32.mrf.mxu3 }
 0x4d8   :  { %2627 = vst [vmem:[#allocation8 + $0xd70] sm:$0xff] %v1831_v29 }
 0x4d9   :  { %2628 = vst [vmem:[#allocation8 + $0xd78] sm:$0xff] %v1944_v56 }
 0x4da   :  { %v2054_v4 = vpop.f32.mrf.mxu0  ;;  %v2167_v36 = vpop.f32.mrf.mxu1 }
 0x4db   :  { %2689 = vst [vmem:[#allocation8 + $0xf60] sm:$0xff] %v2054_v4 }
 0x4dc   :  { %2690 = vst [vmem:[#allocation8 + $0xf68] sm:$0xff] %v2167_v36 }
 0x4df   :  { %v1834_v13 = vpop.f32.mrf.mxu2  ;;  %v1947_v7 = vpop.f32.mrf.mxu3 }
 0x4e0   :  { %2629 = vst [vmem:[#allocation8 + $0xd80] sm:$0xff] %v1834_v13 }
 0x4e1   :  { %2630 = vst [vmem:[#allocation8 + $0xd88] sm:$0xff] %v1947_v7 }
 0x4e2   :  { %v2057_v41 = vpop.f32.mrf.mxu0  ;;  %v2170_v39 = vpop.f32.mrf.mxu1 }
 0x4e3   :  { %2691 = vst [vmem:[#allocation8 + $0xf70] sm:$0xff] %v2057_v41 }
 0x4e4   :  { %2692 = vst [vmem:[#allocation8 + $0xf78] sm:$0xff] %v2170_v39 }
 0x4e7   :  { %v1837_v3 = vpop.f32.mrf.mxu2  ;;  %v1950_v9 = vpop.f32.mrf.mxu3 }
 0x4e8   :  { %2631 = vst [vmem:[#allocation8 + $0xd90] sm:$0xff] %v1837_v3 }
 0x4e9   :  { %2632 = vst [vmem:[#allocation8 + $0xd98] sm:$0xff] %v1950_v9 }
 0x4ea   :  { %v2060_v12 = vpop.f32.mrf.mxu0  ;;  %v2173_v54 = vpop.f32.mrf.mxu1 }
 0x4eb   :  { %2693 = vst [vmem:[#allocation8 + $0xf80] sm:$0xff] %v2060_v12 }
 0x4ec   :  { %2694 = vst [vmem:[#allocation8 + $0xf88] sm:$0xff] %v2173_v54 }
 0x4ef   :  { %v1840_v37 = vpop.f32.mrf.mxu2  ;;  %v1953_v44 = vpop.f32.mrf.mxu3 }
 0x4f0   :  { %2633 = vst [vmem:[#allocation8 + $0xda0] sm:$0xff] %v1840_v37 }
 0x4f1   :  { %2634 = vst [vmem:[#allocation8 + $0xda8] sm:$0xff] %v1953_v44 }
 0x4f2   :  { %v2063_v16 = vpop.f32.mrf.mxu0  ;;  %v2176_v20 = vpop.f32.mrf.mxu1 }
 0x4f3   :  { %2695 = vst [vmem:[#allocation8 + $0xf90] sm:$0xff] %v2063_v16 }
 0x4f4   :  { %2696 = vst [vmem:[#allocation8 + $0xf98] sm:$0xff] %v2176_v20 }
 0x4f7   :  { %v1843_v46 = vpop.f32.mrf.mxu2  ;;  %v1956_v55 = vpop.f32.mrf.mxu3 }
 0x4f8   :  { %2635 = vst [vmem:[#allocation8 + $0xdb0] sm:$0xff] %v1843_v46 }
 0x4f9   :  { %2636 = vst [vmem:[#allocation8 + $0xdb8] sm:$0xff] %v1956_v55 }
 0x4fa   :  { %v2066_v47 = vpop.f32.mrf.mxu0  ;;  %v2179_v21 = vpop.f32.mrf.mxu1 }
 0x4fb   :  { %2697 = vst [vmem:[#allocation8 + $0xfa0] sm:$0xff] %v2066_v47 }
 0x4fc   :  { %2698 = vst [vmem:[#allocation8 + $0xfa8] sm:$0xff] %v2179_v21 }
 0x4ff   :  { %v1846_v8 = vpop.f32.mrf.mxu2  ;;  %v1959_v38 = vpop.f32.mrf.mxu3 }
 0x500   :  { %2637 = vst [vmem:[#allocation8 + $0xdc0] sm:$0xff] %v1846_v8 }
 0x501   :  { %2638 = vst [vmem:[#allocation8 + $0xdc8] sm:$0xff] %v1959_v38 }
 0x502   :  { %v2069_v58 = vpop.f32.mrf.mxu0  ;;  %v2182_v50 = vpop.f32.mrf.mxu1 }
 0x503   :  { %2699 = vst [vmem:[#allocation8 + $0xfb0] sm:$0xff] %v2069_v58 }
 0x504   :  { %2700 = vst [vmem:[#allocation8 + $0xfb8] sm:$0xff] %v2182_v50 }
 0x507   :  { %v1849_v15 = vpop.f32.mrf.mxu2  ;;  %v1962_v34 = vpop.f32.mrf.mxu3 }
 0x508   :  { %2639 = vst [vmem:[#allocation8 + $0xdd0] sm:$0xff] %v1849_v15 }
 0x509   :  { %2640 = vst [vmem:[#allocation8 + $0xdd8] sm:$0xff] %v1962_v34 }
 0x50a   :  { %v2072_v57 = vpop.f32.mrf.mxu0  ;;  %v2185_v28 = vpop.f32.mrf.mxu1 }
 0x50b   :  { %2701 = vst [vmem:[#allocation8 + $0xfc0] sm:$0xff] %v2072_v57 }
 0x50c   :  { %2702 = vst [vmem:[#allocation8 + $0xfc8] sm:$0xff] %v2185_v28 }
 0x50f   :  { %v1852_v26 = vpop.f32.mrf.mxu2  ;;  %v1965_v33 = vpop.f32.mrf.mxu3 }
 0x510   :  { %2641 = vst [vmem:[#allocation8 + $0xde0] sm:$0xff] %v1852_v26 }
 0x511   :  { %2642 = vst [vmem:[#allocation8 + $0xde8] sm:$0xff] %v1965_v33 }
 0x512   :  { %v2075_v60 = vpop.f32.mrf.mxu0  ;;  %v2188_v23 = vpop.f32.mrf.mxu1 }
 0x513   :  { %2703 = vst [vmem:[#allocation8 + $0xfd0] sm:$0xff] %v2075_v60 }
 0x514   :  { %2704 = vst [vmem:[#allocation8 + $0xfd8] sm:$0xff] %v2188_v23 }
 0x517   :  { %v1855_v61 = vpop.f32.mrf.mxu2  ;;  %v1968_v62 = vpop.f32.mrf.mxu3 }
 0x518   :  { %2643 = vst [vmem:[#allocation8 + $0xdf0] sm:$0xff] %v1855_v61 }
 0x519   :  { %2644 = vst [vmem:[#allocation8 + $0xdf8] sm:$0xff] %v1968_v62 }
 0x51a   :  { %v2078_v25 = vpop.f32.mrf.mxu0  ;;  %v2191_v49 = vpop.f32.mrf.mxu1 }
 0x51b   :  { %2705 = vst [vmem:[#allocation8 + $0xfe0] sm:$0xff] %v2078_v25 }
 0x51c   :  { %2706 = vst [vmem:[#allocation8 + $0xfe8] sm:$0xff] %v2191_v49 }
 0x522   :  { %v2081_v48 = vpop.f32.mrf.mxu0  ;;  %v2194_v43 = vpop.f32.mrf.mxu1 }
 0x523   :  { %2707 = vst [vmem:[#allocation8 + $0xff0] sm:$0xff] %v2081_v48 }
 0x524   :  { %2708 = vst [vmem:[#allocation8 + $0xff8] sm:$0xff] %v2194_v43 }
 0x525   :  { %2721 = dma.vmem_to_hbm [thread:$0]  %s2714_s29, 65536, %s2716_s5, [#allocation4], %s3420_s20, %s3420_s20, %s3421_s21  }
 0x526   :  { %3417 = dma.done.wait [#allocation4], 65536  }
 0x527   :  { %3418 = vsyncadd [#allocation4], 4294901760 }
 0x528   :  { %2726 = vsyncpa [#allocation3], 1 }
 0x529   :  { %2727 = vsyncpa [#allocation6], 1 }
 0x52a   :  { %2728 = vsyncpa [#allocation4], 1 }

</bundles_post_ra>
